<compile_context>
chip_gen: v7x
topology: tpu7x:2x2x1
jax: 0.10.0
libtpu: 0.0.40
codegen_flags: <defaults>
</compile_context>

<pallas_src>
import functools
import jax
import jax.numpy as jnp
from jax.experimental import pallas as pl
from jax.experimental.pallas import tpu as pltpu

# ---------------- model hyper-parameters (small, DistilBERT-like) -----------
VOCAB = 1000
BATCH = 2
SEQ = 8
HIDDEN = 32
NUM_HEADS = 4
HEAD_DIM = HIDDEN // NUM_HEADS
FFN = 64
NUM_LAYERS = 2
LN_EPS = 1e-12
NUM_CLASSES = {"A": 3, "B": 2}
LOGIT_PAD = 128          # lane-dense width for qkv slab / logits (A=[:3], B=[3:5])

ROWS_PER_LAYER = 8       # [qkv_b, bo, ln1_g, ln1_b, b1, b2, ln2_g, ln2_b]


def vec_slab_layout(batch, seq, num_heads, num_layers):
    """Row layout of the packed (N,128) f32 vector slab (shared init<->kernel)."""
    rows = {"emb_ln_g": 0, "emb_ln_b": 1, "clf_b": 2}
    r = 3
    rows["pool"] = r;        r += batch              # (B, B*S) mean-pool matrix
    rows["pos"] = r;         r += batch * seq        # pos-emb tiled over batch
    rows["head_mask"] = r;   r += num_heads          # per-head lane masks
    rows["batch_bias"] = r;  r += batch * seq        # cross-batch score bias
    rows["layer0"] = r;      r += ROWS_PER_LAYER * num_layers
    n_rows = ((r + 7) // 8) * 8
    return rows, n_rows


# ---------------------------- fused Pallas kernel ----------------------------
def fused_forward_kernel(ids_ref, word_emb_ref, vec_ref, qkvc_ref,
                         wo_ref, w1_ref, w2_ref, out_ref,
                         *, num_layers, num_heads, batch, seq):
    f32, bf16 = jnp.float32, jnp.bfloat16
    vocab, H = word_emb_ref.shape
    ffn = w1_ref.shape[2]
    BS = batch * seq
    hd = H // num_heads
    scale = 1.0 / float(hd) ** 0.5
    rows, _ = vec_slab_layout(batch, seq, num_heads, num_layers)

    def vrow(r, width=H):                       # static row/lane slice of the slab
        return vec_ref[r:r + 1, 0:width]

    def layernorm(v, g, b):                     # f32 VPU math (v5e-safe)
        mu = jnp.mean(v, axis=-1, keepdims=True)
        var = jnp.mean((v - mu) ** 2, axis=-1, keepdims=True)
        return (v - mu) * jax.lax.rsqrt(var + LN_EPS) * g + b

    # ---- embedding gather fused as a lane-dense one-hot matmul on the MXU.
    # TODO(synk): out-of-range token ids produce a zero row here (nn.Embedding
    #             would raise); irrelevant for valid ids.
    onehot = (ids_ref[...] ==
              jax.lax.broadcasted_iota(jnp.int32, (BS, vocab), 1)).astype(bf16)
    x = jnp.dot(onehot, word_emb_ref[...], preferred_element_type=f32)   # (BS,H)
    x = x + vec_ref[rows["pos"]:rows["pos"] + BS, 0:H]                   # + pos emb
    h = layernorm(x, vrow(rows["emb_ln_g"]), vrow(rows["emb_ln_b"]))

    head_masks = vec_ref[rows["head_mask"]:rows["head_mask"] + num_heads, 0:H]
    batch_bias = vec_ref[rows["batch_bias"]:rows["batch_bias"] + BS, 0:BS]

    # ---- transformer encoder stack (statically unrolled; weights stay in VMEM).
    for l in range(num_layers):
        base = rows["layer0"] + ROWS_PER_LAYER * l
        qkv_b = vec_ref[base:base + 1, :]                       # (1,128)
        bo = vrow(base + 1)
        ln1_g, ln1_b = vrow(base + 2), vrow(base + 3)
        b1 = vrow(base + 4, ffn)
        b2 = vrow(base + 5)
        ln2_g, ln2_b = vrow(base + 6), vrow(base + 7)

        # Fused QKV: single (BS,H)x(H,128) matmul, lane-dense 128-wide result.
        qkv = jnp.dot(h.astype(bf16), qkvc_ref[l],
                      preferred_element_type=f32) + qkv_b       # (BS,128)
        q = qkv[:, 0:H].astype(bf16)
        k = qkv[:, H:2 * H]
        v = qkv[:, 2 * H:3 * H]

        # Lane-dense attention: per-head lane masks on K/V, full (BS,BS) scores
        # with an additive cross-batch bias, ctx accumulated in registers.
        # TODO(synk): no padding mask — inputs are fixed-length token ids.
        ctx = jnp.zeros((BS, H), f32)
        for hh in range(num_heads):
            m = head_masks[hh:hh + 1, :]                        # (1,H)
            kh = (k * m).astype(bf16)
            vh = (v * m).astype(bf16)
            s = jax.lax.dot_general(q, kh, (((1,), (1,)), ((), ())),
                                    preferred_element_type=f32)  # (BS,BS), no K^T
            p = jax.nn.softmax(s * scale + batch_bias, axis=-1)  # f32
            ctx = ctx + jnp.dot(p.astype(bf16), vh,
                                preferred_element_type=f32)      # head lanes only

        attn = jnp.dot(ctx.astype(bf16), wo_ref[l],
                       preferred_element_type=f32) + bo
        h = layernorm(h + attn, ln1_g, ln1_b)

        # FFN.  TODO(synk): HF DistilBERT uses exact erf GELU; tanh approx kept
        #                   for guaranteed TPU lowering (tiny drift).
        ff = jax.nn.gelu(jnp.dot(h.astype(bf16), w1_ref[l],
                                 preferred_element_type=f32) + b1,
                         approximate=True)
        ff = jnp.dot(ff.astype(bf16), w2_ref[l],
                     preferred_element_type=f32) + b2
        h = layernorm(h + ff, ln2_g, ln2_b)

    # ---- mean-pool over the sequence via the precomputed (B, BS) pool matrix.
    pool = vec_ref[rows["pool"]:rows["pool"] + batch, 0:BS]
    pooled = jnp.dot(pool.astype(bf16), h.astype(bf16),
                     preferred_element_type=f32)                 # (B,H)

    # ---- both task heads in one lane-dense (B,128) store (slot L of qkvc slab).
    logits = (jnp.dot(pooled.astype(bf16), qkvc_ref[num_layers],
                      preferred_element_type=f32)
              + vec_ref[rows["clf_b"]:rows["clf_b"] + 1, :])
    out_ref[...] = logits.astype(out_ref.dtype)


# ---------------------------- wrapper ----------------------------------------
def _full_spec(a):
    return pl.BlockSpec(a.shape, lambda i, nd=a.ndim: (0,) * nd)


@jax.jit
def encode_and_classify(token_ids, packed):
    """Runs the shared encoder ONCE and returns (logits_A, logits_B)."""
    B, S = token_ids.shape
    ids = token_ids.reshape(B * S, 1).astype(jnp.int32)

    inputs = [ids, packed["word_emb"], packed["vec_slab"], packed["qkvc_w"],
              packed["wo_w"], packed["w1_w"], packed["w2_w"]]

    kernel = functools.partial(
        fused_forward_kernel,
        num_layers=NUM_LAYERS, num_heads=NUM_HEADS, batch=B, seq=S)

    logits_pad = pl.pallas_call(
        kernel,
        out_shape=jax.ShapeDtypeStruct((B, LOGIT_PAD), jnp.float32),
        grid=(1,),
        in_specs=[_full_spec(a) for a in inputs],
        out_specs=pl.BlockSpec((B, LOGIT_PAD), lambda i: (0, 0)),
        compiler_params=pltpu.CompilerParams(
            dimension_semantics=("arbitrary",)),   # single step; trivial grid
    )(*inputs)

    nA, nB = NUM_CLASSES["A"], NUM_CLASSES["B"]
    return logits_pad[:, :nA], logits_pad[:, nA:nA + nB]


def multitask_forward(token_ids, params, task="A"):
    # API parity with the PyTorch module; encoder is shared and both heads come
    # out of the same fused kernel.
    logits_a, logits_b = encode_and_classify(token_ids, params)
    return logits_a if task == "A" else logits_b


# ---------------------------- parameter init + packing (once) ----------------
def init_params(key):
    H, L, S, B, NH = HIDDEN, NUM_LAYERS, SEQ, BATCH, NUM_HEADS
    BS = B * S
    hd = H // NH

    def nrm(k, shape, scale=0.02):
        return (scale * jax.random.normal(k, shape)).astype(jnp.float32)

    keys = iter(jax.random.split(key, 32))

    word_emb = nrm(next(keys), (VOCAB, H))
    pos_emb = nrm(next(keys), (S, H))

    # ---- packed vector slab: all bias/LN vectors + constants, padded to 128.
    rows, n_rows = vec_slab_layout(B, S, NH, L)
    vec = jnp.zeros((n_rows, LOGIT_PAD), jnp.float32)
    vec = vec.at[rows["emb_ln_g"], :H].set(1.0)
    # emb_ln_b, clf_b and all linear biases stay zero (no checkpoint available).
    col = jnp.arange(BS)[None, :]
    pool = jnp.where((col // S) == jnp.arange(B)[:, None], 1.0 / S, 0.0)
    vec = vec.at[rows["pool"]:rows["pool"] + B, :BS].set(pool)
    vec = vec.at[rows["pos"]:rows["pos"] + BS, :H].set(jnp.tile(pos_emb, (B, 1)))
    lane = jnp.arange(H)[None, :]
    head_id = jnp.arange(NH)[:, None]
    hmask = ((lane >= head_id * hd) & (lane < (head_id + 1) * hd)).astype(jnp.float32)
    vec = vec.at[rows["head_mask"]:rows["head_mask"] + NH, :H].set(hmask)
    same_b = (jnp.arange(BS)[:, None] // S) == (jnp.arange(BS)[None, :] // S)
    bbias = jnp.where(same_b, 0.0, -1e30).astype(jnp.float32)
    vec = vec.at[rows["batch_bias"]:rows["batch_bias"] + BS, :BS].set(bbias)
    for l in range(L):
        base = rows["layer0"] + ROWS_PER_LAYER * l
        vec = vec.at[base + 2, :H].set(1.0)   # ln1_gamma
        vec = vec.at[base + 6, :H].set(1.0)   # ln2_gamma

    # ---- fused QKV weights (lane-dense, 128 wide) + packed classifier heads.
    qkvc = jnp.zeros((L + 1, H, LOGIT_PAD), jnp.float32)
    for l in range(L):
        qkvc = qkvc.at[l, :, 0:H].set(nrm(next(keys), (H, H)))            # Wq
        qkvc = qkvc.at[l, :, H:2 * H].set(nrm(next(keys), (H, H)))         # Wk
        qkvc = qkvc.at[l, :, 2 * H:3 * H].set(nrm(next(keys), (H, H)))     # Wv
    nA, nB = NUM_CLASSES["A"], NUM_CLASSES["B"]
    qkvc = qkvc.at[L, :, :nA].set(nrm(next(keys), (H, nA)))                # clf A
    qkvc = qkvc.at[L, :, nA:nA + nB].set(nrm(next(keys), (H, nB)))         # clf B

    wo = jnp.stack([nrm(next(keys), (H, H)) for _ in range(L)])
    w1 = jnp.stack([nrm(next(keys), (H, FFN)) for _ in range(L)])
    w2 = jnp.stack([nrm(next(keys), (FFN, H)) for _ in range(L)])

    return {
        "word_emb": word_emb.astype(jnp.bfloat16),   # MXU operand (one-hot gather)
        "vec_slab": vec,                             # f32: LN / bias / constants
        "qkvc_w": qkvc.astype(jnp.bfloat16),
        "wo_w": wo.astype(jnp.bfloat16),
        "w1_w": w1.astype(jnp.bfloat16),
        "w2_w": w2.astype(jnp.bfloat16),
    }


# ---------------------------- main --------------------------------------------
if __name__ == "__main__":
    key = jax.random.PRNGKey(0)
    pkey, dkey = jax.random.split(key)
    params = init_params(pkey)

    # "sentences" stand-in: deterministic token ids (tokenizer is out of scope).
    token_ids = jax.random.randint(dkey, (BATCH, SEQ), 0, VOCAB, dtype=jnp.int32)

    logits_a, logits_b = encode_and_classify(token_ids, params)
    jax.block_until_ready((logits_a, logits_b))

    assert logits_a.shape == (BATCH, NUM_CLASSES["A"]), logits_a.shape
    assert logits_b.shape == (BATCH, NUM_CLASSES["B"]), logits_b.shape
    assert bool(jnp.all(jnp.isfinite(logits_a))) and bool(jnp.all(jnp.isfinite(logits_b)))
    print("KERNEL_OK")
</pallas_src>

<mosaic_0001>
module attributes {stable_mosaic.version = 11 : i64} {
  func.func @fused_forward_kernel(%arg0: i32, %arg1: memref<16x1xi32, #tpu.memory_space<vmem>>, %arg2: memref<1000x32xbf16, #tpu.memory_space<vmem>>, %arg3: memref<64x128xf32, #tpu.memory_space<vmem>>, %arg4: memref<3x32x128xbf16, #tpu.memory_space<vmem>>, %arg5: memref<2x32x32xbf16, #tpu.memory_space<vmem>>, %arg6: memref<2x32x64xbf16, #tpu.memory_space<vmem>>, %arg7: memref<2x64x32xbf16, #tpu.memory_space<vmem>>, %arg8: memref<2x128xf32, #tpu.memory_space<vmem>>) attributes {dimension_semantics = [#tpu.dimension_semantics<arbitrary>], iteration_bounds = array<i64: 1>, scalar_prefetch = 0 : i64, scratch_operands = 0 : i64, tpu.core_type = #tpu.core_type<tc>, window_params = [{pipeline_mode = #tpu.pipeline_mode<synchronous>, transform_indices = @transform_0, window_bounds = array<i64: 16, 1>}, {pipeline_mode = #tpu.pipeline_mode<synchronous>, transform_indices = @transform_1, window_bounds = array<i64: 1000, 32>}, {pipeline_mode = #tpu.pipeline_mode<synchronous>, transform_indices = @transform_2, window_bounds = array<i64: 64, 128>}, {pipeline_mode = #tpu.pipeline_mode<synchronous>, transform_indices = @transform_3, window_bounds = array<i64: 3, 32, 128>}, {pipeline_mode = #tpu.pipeline_mode<synchronous>, transform_indices = @transform_4, window_bounds = array<i64: 2, 32, 32>}, {pipeline_mode = #tpu.pipeline_mode<synchronous>, transform_indices = @transform_5, window_bounds = array<i64: 2, 32, 64>}, {pipeline_mode = #tpu.pipeline_mode<synchronous>, transform_indices = @transform_6, window_bounds = array<i64: 2, 64, 32>}, {pipeline_mode = #tpu.pipeline_mode<synchronous>, transform_indices = @transform_7, window_bounds = array<i64: 2, 128>}]} {
    %c0 = arith.constant 0 : index
    %c0_0 = arith.constant 0 : index
    %0 = vector.load %arg1[%c0, %c0_0] : memref<16x1xi32, #tpu.memory_space<vmem>>, vector<16x1xi32>
    %1 = tpu.iota {dimensions = array<i32: 1>} : vector<16x1000xi32>
    %2 = vector.broadcast %0 : vector<16x1xi32> to vector<16x1000xi32>
    %3 = arith.cmpi eq, %2, %1 : vector<16x1000xi32>
    %4 = arith.extui %3 : vector<16x1000xi1> to vector<16x1000xi32>
    %5 = arith.sitofp %4 : vector<16x1000xi32> to vector<16x1000xf32>
    %6 = arith.truncf %5 : vector<16x1000xf32> to vector<16x1000xbf16>
    %c0_1 = arith.constant 0 : index
    %c0_2 = arith.constant 0 : index
    %7 = vector.load %arg2[%c0_1, %c0_2] : memref<1000x32xbf16, #tpu.memory_space<vmem>>, vector<1000x32xbf16>
    %cst = arith.constant dense<0.000000e+00> : vector<16x32xf32>
    %8 = tpu.matmul %6, %7, %cst {dimension_numbers = #tpu.dot_dimension_numbers<[1], [0], [0], [1], [0, 0, 1, 1], [], []>} : vector<16x1000xbf16>, vector<1000x32xbf16>, vector<16x32xf32> -> vector<16x32xf32>
    %c5 = arith.constant 5 : index
    %c0_3 = arith.constant 0 : index
    %9 = vector.load %arg3[%c5, %c0_3] : memref<64x128xf32, #tpu.memory_space<vmem>>, vector<16x32xf32>
    %10 = arith.addf %8, %9 : vector<16x32xf32>
    %c0_4 = arith.constant 0 : index
    %c0_5 = arith.constant 0 : index
    %11 = vector.load %arg3[%c0_4, %c0_5] : memref<64x128xf32, #tpu.memory_space<vmem>>, vector<1x32xf32>
    %c1 = arith.constant 1 : index
    %c0_6 = arith.constant 0 : index
    %12 = vector.load %arg3[%c1, %c0_6] : memref<64x128xf32, #tpu.memory_space<vmem>>, vector<1x32xf32>
    %cst_7 = arith.constant dense<0.000000e+00> : vector<16xf32>
    %13 = vector.multi_reduction <add>, %10, %cst_7 [1] : vector<16x32xf32> to vector<16xf32>
    %14 = vector.shape_cast %13 : vector<16xf32> to vector<16x1xf32>
    %cst_8 = arith.constant 3.200000e+01 : f32
    %15 = vector.broadcast %cst_8 : f32 to vector<16x1xf32>
    %16 = arith.divf %14, %15 : vector<16x1xf32>
    %17 = vector.broadcast %16 : vector<16x1xf32> to vector<16x32xf32>
    %18 = arith.subf %10, %17 : vector<16x32xf32>
    %19 = arith.mulf %18, %18 : vector<16x32xf32>
    %cst_9 = arith.constant dense<0.000000e+00> : vector<16xf32>
    %20 = vector.multi_reduction <add>, %19, %cst_9 [1] : vector<16x32xf32> to vector<16xf32>
    %21 = vector.shape_cast %20 : vector<16xf32> to vector<16x1xf32>
    %cst_10 = arith.constant 3.200000e+01 : f32
    %22 = vector.broadcast %cst_10 : f32 to vector<16x1xf32>
    %23 = arith.divf %21, %22 : vector<16x1xf32>
    %24 = vector.broadcast %16 : vector<16x1xf32> to vector<16x32xf32>
    %25 = arith.subf %10, %24 : vector<16x32xf32>
    %cst_11 = arith.constant 9.99999996E-13 : f32
    %26 = vector.broadcast %cst_11 : f32 to vector<16x1xf32>
    %27 = arith.addf %23, %26 : vector<16x1xf32>
    %28 = math.rsqrt %27 : vector<16x1xf32>
    %29 = vector.broadcast %28 : vector<16x1xf32> to vector<16x32xf32>
    %30 = arith.mulf %25, %29 : vector<16x32xf32>
    %31 = vector.broadcast %11 : vector<1x32xf32> to vector<16x32xf32>
    %32 = arith.mulf %30, %31 : vector<16x32xf32>
    %33 = vector.broadcast %12 : vector<1x32xf32> to vector<16x32xf32>
    %34 = arith.addf %32, %33 : vector<16x32xf32>
    %c21 = arith.constant 21 : index
    %c0_12 = arith.constant 0 : index
    %35 = vector.load %arg3[%c21, %c0_12] : memref<64x128xf32, #tpu.memory_space<vmem>>, vector<4x32xf32>
    %c25 = arith.constant 25 : index
    %c0_13 = arith.constant 0 : index
    %36 = vector.load %arg3[%c25, %c0_13] : memref<64x128xf32, #tpu.memory_space<vmem>>, vector<16x16xf32>
    %c41 = arith.constant 41 : index
    %c0_14 = arith.constant 0 : index
    %37 = vector.load %arg3[%c41, %c0_14] : memref<64x128xf32, #tpu.memory_space<vmem>>, vector<1x128xf32>
    %c42 = arith.constant 42 : index
    %c0_15 = arith.constant 0 : index
    %38 = vector.load %arg3[%c42, %c0_15] : memref<64x128xf32, #tpu.memory_space<vmem>>, vector<1x32xf32>
    %c43 = arith.constant 43 : index
    %c0_16 = arith.constant 0 : index
    %39 = vector.load %arg3[%c43, %c0_16] : memref<64x128xf32, #tpu.memory_space<vmem>>, vector<1x32xf32>
    %c44 = arith.constant 44 : index
    %c0_17 = arith.constant 0 : index
    %40 = vector.load %arg3[%c44, %c0_17] : memref<64x128xf32, #tpu.memory_space<vmem>>, vector<1x32xf32>
    %c45 = arith.constant 45 : index
    %c0_18 = arith.constant 0 : index
    %41 = vector.load %arg3[%c45, %c0_18] : memref<64x128xf32, #tpu.memory_space<vmem>>, vector<1x64xf32>
    %c46 = arith.constant 46 : index
    %c0_19 = arith.constant 0 : index
    %42 = vector.load %arg3[%c46, %c0_19] : memref<64x128xf32, #tpu.memory_space<vmem>>, vector<1x32xf32>
    %c47 = arith.constant 47 : index
    %c0_20 = arith.constant 0 : index
    %43 = vector.load %arg3[%c47, %c0_20] : memref<64x128xf32, #tpu.memory_space<vmem>>, vector<1x32xf32>
    %c48 = arith.constant 48 : index
    %c0_21 = arith.constant 0 : index
    %44 = vector.load %arg3[%c48, %c0_21] : memref<64x128xf32, #tpu.memory_space<vmem>>, vector<1x32xf32>
    %45 = arith.truncf %34 : vector<16x32xf32> to vector<16x32xbf16>
    %c0_22 = arith.constant 0 : index
    %c0_23 = arith.constant 0 : index
    %c0_24 = arith.constant 0 : index
    %46 = vector.load %arg4[%c0_22, %c0_23, %c0_24] : memref<3x32x128xbf16, #tpu.memory_space<vmem>>, vector<1x32x128xbf16>
    %47 = vector.shape_cast %46 : vector<1x32x128xbf16> to vector<32x128xbf16>
    %cst_25 = arith.constant dense<0.000000e+00> : vector<16x128xf32>
    %48 = tpu.matmul %45, %47, %cst_25 {dimension_numbers = #tpu.dot_dimension_numbers<[1], [0], [0], [1], [0, 0, 1, 1], [], []>} : vector<16x32xbf16>, vector<32x128xbf16>, vector<16x128xf32> -> vector<16x128xf32>
    %49 = vector.broadcast %37 : vector<1x128xf32> to vector<16x128xf32>
    %50 = arith.addf %48, %49 : vector<16x128xf32>
    %51 = vector.extract_strided_slice %50 {offsets = [0, 0], sizes = [16, 32], strides = [1, 1]} : vector<16x128xf32> to vector<16x32xf32>
    %52 = arith.truncf %51 : vector<16x32xf32> to vector<16x32xbf16>
    %53 = vector.extract_strided_slice %50 {offsets = [0, 32], sizes = [16, 32], strides = [1, 1]} : vector<16x128xf32> to vector<16x32xf32>
    %54 = vector.extract_strided_slice %50 {offsets = [0, 64], sizes = [16, 32], strides = [1, 1]} : vector<16x128xf32> to vector<16x32xf32>
    %cst_26 = arith.constant 0.000000e+00 : f32
    %55 = vector.broadcast %cst_26 : f32 to vector<16x32xf32>
    %56 = vector.extract_strided_slice %35 {offsets = [0, 0], sizes = [1, 32], strides = [1, 1]} : vector<4x32xf32> to vector<1x32xf32>
    %57 = vector.broadcast %56 : vector<1x32xf32> to vector<16x32xf32>
    %58 = arith.mulf %53, %57 : vector<16x32xf32>
    %59 = arith.truncf %58 : vector<16x32xf32> to vector<16x32xbf16>
    %60 = vector.broadcast %56 : vector<1x32xf32> to vector<16x32xf32>
    %61 = arith.mulf %54, %60 : vector<16x32xf32>
    %62 = arith.truncf %61 : vector<16x32xf32> to vector<16x32xbf16>
    %cst_27 = arith.constant dense<0.000000e+00> : vector<16x16xf32>
    %63 = tpu.matmul %52, %59, %cst_27 {dimension_numbers = #tpu.dot_dimension_numbers<[1], [1], [0], [0], [0, 0, 1, 0], [], []>} : vector<16x32xbf16>, vector<16x32xbf16>, vector<16x16xf32> -> vector<16x16xf32>
    %cst_28 = arith.constant 0.353553385 : f32
    %64 = vector.broadcast %cst_28 : f32 to vector<16x16xf32>
    %65 = arith.mulf %63, %64 : vector<16x16xf32>
    %66 = arith.addf %65, %36 : vector<16x16xf32>
    %cst_29 = arith.constant dense<0xFF800000> : vector<16xf32>
    %67 = vector.multi_reduction <maximumf>, %66, %cst_29 [1] : vector<16x16xf32> to vector<16xf32>
    %cst_30 = arith.constant 0xFF800000 : f32
    %68 = vector.broadcast %cst_30 : f32 to vector<16xf32>
    %69 = arith.maximumf %68, %67 : vector<16xf32>
    %70 = vector.shape_cast %69 : vector<16xf32> to vector<16x1xf32>
    %71 = vector.broadcast %70 : vector<16x1xf32> to vector<16x16xf32>
    %72 = arith.subf %66, %71 : vector<16x16xf32>
    %73 = math.exp %72 : vector<16x16xf32>
    %cst_31 = arith.constant dense<0.000000e+00> : vector<16xf32>
    %74 = vector.multi_reduction <add>, %73, %cst_31 [1] : vector<16x16xf32> to vector<16xf32>
    %75 = vector.shape_cast %74 : vector<16xf32> to vector<16x1xf32>
    %76 = vector.broadcast %75 : vector<16x1xf32> to vector<16x16xf32>
    %77 = arith.divf %73, %76 : vector<16x16xf32>
    %78 = arith.truncf %77 : vector<16x16xf32> to vector<16x16xbf16>
    %cst_32 = arith.constant dense<0.000000e+00> : vector<16x32xf32>
    %79 = tpu.matmul %78, %62, %cst_32 {dimension_numbers = #tpu.dot_dimension_numbers<[1], [0], [0], [1], [0, 0, 1, 1], [], []>} : vector<16x16xbf16>, vector<16x32xbf16>, vector<16x32xf32> -> vector<16x32xf32>
    %80 = arith.addf %55, %79 : vector<16x32xf32>
    %81 = vector.extract_strided_slice %35 {offsets = [1, 0], sizes = [1, 32], strides = [1, 1]} : vector<4x32xf32> to vector<1x32xf32>
    %82 = vector.broadcast %81 : vector<1x32xf32> to vector<16x32xf32>
    %83 = arith.mulf %53, %82 : vector<16x32xf32>
    %84 = arith.truncf %83 : vector<16x32xf32> to vector<16x32xbf16>
    %85 = vector.broadcast %81 : vector<1x32xf32> to vector<16x32xf32>
    %86 = arith.mulf %54, %85 : vector<16x32xf32>
    %87 = arith.truncf %86 : vector<16x32xf32> to vector<16x32xbf16>
    %cst_33 = arith.constant dense<0.000000e+00> : vector<16x16xf32>
    %88 = tpu.matmul %52, %84, %cst_33 {dimension_numbers = #tpu.dot_dimension_numbers<[1], [1], [0], [0], [0, 0, 1, 0], [], []>} : vector<16x32xbf16>, vector<16x32xbf16>, vector<16x16xf32> -> vector<16x16xf32>
    %cst_34 = arith.constant 0.353553385 : f32
    %89 = vector.broadcast %cst_34 : f32 to vector<16x16xf32>
    %90 = arith.mulf %88, %89 : vector<16x16xf32>
    %91 = arith.addf %90, %36 : vector<16x16xf32>
    %cst_35 = arith.constant dense<0xFF800000> : vector<16xf32>
    %92 = vector.multi_reduction <maximumf>, %91, %cst_35 [1] : vector<16x16xf32> to vector<16xf32>
    %cst_36 = arith.constant 0xFF800000 : f32
    %93 = vector.broadcast %cst_36 : f32 to vector<16xf32>
    %94 = arith.maximumf %93, %92 : vector<16xf32>
    %95 = vector.shape_cast %94 : vector<16xf32> to vector<16x1xf32>
    %96 = vector.broadcast %95 : vector<16x1xf32> to vector<16x16xf32>
    %97 = arith.subf %91, %96 : vector<16x16xf32>
    %98 = math.exp %97 : vector<16x16xf32>
    %cst_37 = arith.constant dense<0.000000e+00> : vector<16xf32>
    %99 = vector.multi_reduction <add>, %98, %cst_37 [1] : vector<16x16xf32> to vector<16xf32>
    %100 = vector.shape_cast %99 : vector<16xf32> to vector<16x1xf32>
    %101 = vector.broadcast %100 : vector<16x1xf32> to vector<16x16xf32>
    %102 = arith.divf %98, %101 : vector<16x16xf32>
    %103 = arith.truncf %102 : vector<16x16xf32> to vector<16x16xbf16>
    %cst_38 = arith.constant dense<0.000000e+00> : vector<16x32xf32>
    %104 = tpu.matmul %103, %87, %cst_38 {dimension_numbers = #tpu.dot_dimension_numbers<[1], [0], [0], [1], [0, 0, 1, 1], [], []>} : vector<16x16xbf16>, vector<16x32xbf16>, vector<16x32xf32> -> vector<16x32xf32>
    %105 = arith.addf %80, %104 : vector<16x32xf32>
    %106 = vector.extract_strided_slice %35 {offsets = [2, 0], sizes = [1, 32], strides = [1, 1]} : vector<4x32xf32> to vector<1x32xf32>
    %107 = vector.broadcast %106 : vector<1x32xf32> to vector<16x32xf32>
    %108 = arith.mulf %53, %107 : vector<16x32xf32>
    %109 = arith.truncf %108 : vector<16x32xf32> to vector<16x32xbf16>
    %110 = vector.broadcast %106 : vector<1x32xf32> to vector<16x32xf32>
    %111 = arith.mulf %54, %110 : vector<16x32xf32>
    %112 = arith.truncf %111 : vector<16x32xf32> to vector<16x32xbf16>
    %cst_39 = arith.constant dense<0.000000e+00> : vector<16x16xf32>
    %113 = tpu.matmul %52, %109, %cst_39 {dimension_numbers = #tpu.dot_dimension_numbers<[1], [1], [0], [0], [0, 0, 1, 0], [], []>} : vector<16x32xbf16>, vector<16x32xbf16>, vector<16x16xf32> -> vector<16x16xf32>
    %cst_40 = arith.constant 0.353553385 : f32
    %114 = vector.broadcast %cst_40 : f32 to vector<16x16xf32>
    %115 = arith.mulf %113, %114 : vector<16x16xf32>
    %116 = arith.addf %115, %36 : vector<16x16xf32>
    %cst_41 = arith.constant dense<0xFF800000> : vector<16xf32>
    %117 = vector.multi_reduction <maximumf>, %116, %cst_41 [1] : vector<16x16xf32> to vector<16xf32>
    %cst_42 = arith.constant 0xFF800000 : f32
    %118 = vector.broadcast %cst_42 : f32 to vector<16xf32>
    %119 = arith.maximumf %118, %117 : vector<16xf32>
    %120 = vector.shape_cast %119 : vector<16xf32> to vector<16x1xf32>
    %121 = vector.broadcast %120 : vector<16x1xf32> to vector<16x16xf32>
    %122 = arith.subf %116, %121 : vector<16x16xf32>
    %123 = math.exp %122 : vector<16x16xf32>
    %cst_43 = arith.constant dense<0.000000e+00> : vector<16xf32>
    %124 = vector.multi_reduction <add>, %123, %cst_43 [1] : vector<16x16xf32> to vector<16xf32>
    %125 = vector.shape_cast %124 : vector<16xf32> to vector<16x1xf32>
    %126 = vector.broadcast %125 : vector<16x1xf32> to vector<16x16xf32>
    %127 = arith.divf %123, %126 : vector<16x16xf32>
    %128 = arith.truncf %127 : vector<16x16xf32> to vector<16x16xbf16>
    %cst_44 = arith.constant dense<0.000000e+00> : vector<16x32xf32>
    %129 = tpu.matmul %128, %112, %cst_44 {dimension_numbers = #tpu.dot_dimension_numbers<[1], [0], [0], [1], [0, 0, 1, 1], [], []>} : vector<16x16xbf16>, vector<16x32xbf16>, vector<16x32xf32> -> vector<16x32xf32>
    %130 = arith.addf %105, %129 : vector<16x32xf32>
    %131 = vector.extract_strided_slice %35 {offsets = [3, 0], sizes = [1, 32], strides = [1, 1]} : vector<4x32xf32> to vector<1x32xf32>
    %132 = vector.broadcast %131 : vector<1x32xf32> to vector<16x32xf32>
    %133 = arith.mulf %53, %132 : vector<16x32xf32>
    %134 = arith.truncf %133 : vector<16x32xf32> to vector<16x32xbf16>
    %135 = vector.broadcast %131 : vector<1x32xf32> to vector<16x32xf32>
    %136 = arith.mulf %54, %135 : vector<16x32xf32>
    %137 = arith.truncf %136 : vector<16x32xf32> to vector<16x32xbf16>
    %cst_45 = arith.constant dense<0.000000e+00> : vector<16x16xf32>
    %138 = tpu.matmul %52, %134, %cst_45 {dimension_numbers = #tpu.dot_dimension_numbers<[1], [1], [0], [0], [0, 0, 1, 0], [], []>} : vector<16x32xbf16>, vector<16x32xbf16>, vector<16x16xf32> -> vector<16x16xf32>
    %cst_46 = arith.constant 0.353553385 : f32
    %139 = vector.broadcast %cst_46 : f32 to vector<16x16xf32>
    %140 = arith.mulf %138, %139 : vector<16x16xf32>
    %141 = arith.addf %140, %36 : vector<16x16xf32>
    %cst_47 = arith.constant dense<0xFF800000> : vector<16xf32>
    %142 = vector.multi_reduction <maximumf>, %141, %cst_47 [1] : vector<16x16xf32> to vector<16xf32>
    %cst_48 = arith.constant 0xFF800000 : f32
    %143 = vector.broadcast %cst_48 : f32 to vector<16xf32>
    %144 = arith.maximumf %143, %142 : vector<16xf32>
    %145 = vector.shape_cast %144 : vector<16xf32> to vector<16x1xf32>
    %146 = vector.broadcast %145 : vector<16x1xf32> to vector<16x16xf32>
    %147 = arith.subf %141, %146 : vector<16x16xf32>
    %148 = math.exp %147 : vector<16x16xf32>
    %cst_49 = arith.constant dense<0.000000e+00> : vector<16xf32>
    %149 = vector.multi_reduction <add>, %148, %cst_49 [1] : vector<16x16xf32> to vector<16xf32>
    %150 = vector.shape_cast %149 : vector<16xf32> to vector<16x1xf32>
    %151 = vector.broadcast %150 : vector<16x1xf32> to vector<16x16xf32>
    %152 = arith.divf %148, %151 : vector<16x16xf32>
    %153 = arith.truncf %152 : vector<16x16xf32> to vector<16x16xbf16>
    %cst_50 = arith.constant dense<0.000000e+00> : vector<16x32xf32>
    %154 = tpu.matmul %153, %137, %cst_50 {dimension_numbers = #tpu.dot_dimension_numbers<[1], [0], [0], [1], [0, 0, 1, 1], [], []>} : vector<16x16xbf16>, vector<16x32xbf16>, vector<16x32xf32> -> vector<16x32xf32>
    %155 = arith.addf %130, %154 : vector<16x32xf32>
    %156 = arith.truncf %155 : vector<16x32xf32> to vector<16x32xbf16>
    %c0_51 = arith.constant 0 : index
    %c0_52 = arith.constant 0 : index
    %c0_53 = arith.constant 0 : index
    %157 = vector.load %arg5[%c0_51, %c0_52, %c0_53] : memref<2x32x32xbf16, #tpu.memory_space<vmem>>, vector<1x32x32xbf16>
    %158 = vector.shape_cast %157 : vector<1x32x32xbf16> to vector<32x32xbf16>
    %cst_54 = arith.constant dense<0.000000e+00> : vector<16x32xf32>
    %159 = tpu.matmul %156, %158, %cst_54 {dimension_numbers = #tpu.dot_dimension_numbers<[1], [0], [0], [1], [0, 0, 1, 1], [], []>} : vector<16x32xbf16>, vector<32x32xbf16>, vector<16x32xf32> -> vector<16x32xf32>
    %160 = vector.broadcast %38 : vector<1x32xf32> to vector<16x32xf32>
    %161 = arith.addf %159, %160 : vector<16x32xf32>
    %162 = arith.addf %34, %161 : vector<16x32xf32>
    %cst_55 = arith.constant dense<0.000000e+00> : vector<16xf32>
    %163 = vector.multi_reduction <add>, %162, %cst_55 [1] : vector<16x32xf32> to vector<16xf32>
    %164 = vector.shape_cast %163 : vector<16xf32> to vector<16x1xf32>
    %cst_56 = arith.constant 3.200000e+01 : f32
    %165 = vector.broadcast %cst_56 : f32 to vector<16x1xf32>
    %166 = arith.divf %164, %165 : vector<16x1xf32>
    %167 = vector.broadcast %166 : vector<16x1xf32> to vector<16x32xf32>
    %168 = arith.subf %162, %167 : vector<16x32xf32>
    %169 = arith.mulf %168, %168 : vector<16x32xf32>
    %cst_57 = arith.constant dense<0.000000e+00> : vector<16xf32>
    %170 = vector.multi_reduction <add>, %169, %cst_57 [1] : vector<16x32xf32> to vector<16xf32>
    %171 = vector.shape_cast %170 : vector<16xf32> to vector<16x1xf32>
    %cst_58 = arith.constant 3.200000e+01 : f32
    %172 = vector.broadcast %cst_58 : f32 to vector<16x1xf32>
    %173 = arith.divf %171, %172 : vector<16x1xf32>
    %174 = vector.broadcast %166 : vector<16x1xf32> to vector<16x32xf32>
    %175 = arith.subf %162, %174 : vector<16x32xf32>
    %cst_59 = arith.constant 9.99999996E-13 : f32
    %176 = vector.broadcast %cst_59 : f32 to vector<16x1xf32>
    %177 = arith.addf %173, %176 : vector<16x1xf32>
    %178 = math.rsqrt %177 : vector<16x1xf32>
    %179 = vector.broadcast %178 : vector<16x1xf32> to vector<16x32xf32>
    %180 = arith.mulf %175, %179 : vector<16x32xf32>
    %181 = vector.broadcast %39 : vector<1x32xf32> to vector<16x32xf32>
    %182 = arith.mulf %180, %181 : vector<16x32xf32>
    %183 = vector.broadcast %40 : vector<1x32xf32> to vector<16x32xf32>
    %184 = arith.addf %182, %183 : vector<16x32xf32>
    %185 = arith.truncf %184 : vector<16x32xf32> to vector<16x32xbf16>
    %c0_60 = arith.constant 0 : index
    %c0_61 = arith.constant 0 : index
    %c0_62 = arith.constant 0 : index
    %186 = vector.load %arg6[%c0_60, %c0_61, %c0_62] : memref<2x32x64xbf16, #tpu.memory_space<vmem>>, vector<1x32x64xbf16>
    %187 = vector.shape_cast %186 : vector<1x32x64xbf16> to vector<32x64xbf16>
    %cst_63 = arith.constant dense<0.000000e+00> : vector<16x64xf32>
    %188 = tpu.matmul %185, %187, %cst_63 {dimension_numbers = #tpu.dot_dimension_numbers<[1], [0], [0], [1], [0, 0, 1, 1], [], []>} : vector<16x32xbf16>, vector<32x64xbf16>, vector<16x64xf32> -> vector<16x64xf32>
    %189 = vector.broadcast %41 : vector<1x64xf32> to vector<16x64xf32>
    %190 = arith.addf %188, %189 : vector<16x64xf32>
    %191 = arith.mulf %190, %190 : vector<16x64xf32>
    %192 = arith.mulf %190, %191 : vector<16x64xf32>
    %cst_64 = arith.constant 4.471500e-02 : f32
    %193 = vector.broadcast %cst_64 : f32 to vector<16x64xf32>
    %194 = arith.mulf %193, %192 : vector<16x64xf32>
    %195 = arith.addf %190, %194 : vector<16x64xf32>
    %cst_65 = arith.constant 0.797884583 : f32
    %196 = vector.broadcast %cst_65 : f32 to vector<16x64xf32>
    %197 = arith.mulf %196, %195 : vector<16x64xf32>
    %198 = math.tanh %197 : vector<16x64xf32>
    %cst_66 = arith.constant 1.000000e+00 : f32
    %199 = vector.broadcast %cst_66 : f32 to vector<16x64xf32>
    %200 = arith.addf %199, %198 : vector<16x64xf32>
    %cst_67 = arith.constant 5.000000e-01 : f32
    %201 = vector.broadcast %cst_67 : f32 to vector<16x64xf32>
    %202 = arith.mulf %201, %200 : vector<16x64xf32>
    %203 = arith.mulf %190, %202 : vector<16x64xf32>
    %204 = arith.truncf %203 : vector<16x64xf32> to vector<16x64xbf16>
    %c0_68 = arith.constant 0 : index
    %c0_69 = arith.constant 0 : index
    %c0_70 = arith.constant 0 : index
    %205 = vector.load %arg7[%c0_68, %c0_69, %c0_70] : memref<2x64x32xbf16, #tpu.memory_space<vmem>>, vector<1x64x32xbf16>
    %206 = vector.shape_cast %205 : vector<1x64x32xbf16> to vector<64x32xbf16>
    %cst_71 = arith.constant dense<0.000000e+00> : vector<16x32xf32>
    %207 = tpu.matmul %204, %206, %cst_71 {dimension_numbers = #tpu.dot_dimension_numbers<[1], [0], [0], [1], [0, 0, 1, 1], [], []>} : vector<16x64xbf16>, vector<64x32xbf16>, vector<16x32xf32> -> vector<16x32xf32>
    %208 = vector.broadcast %42 : vector<1x32xf32> to vector<16x32xf32>
    %209 = arith.addf %207, %208 : vector<16x32xf32>
    %210 = arith.addf %184, %209 : vector<16x32xf32>
    %cst_72 = arith.constant dense<0.000000e+00> : vector<16xf32>
    %211 = vector.multi_reduction <add>, %210, %cst_72 [1] : vector<16x32xf32> to vector<16xf32>
    %212 = vector.shape_cast %211 : vector<16xf32> to vector<16x1xf32>
    %cst_73 = arith.constant 3.200000e+01 : f32
    %213 = vector.broadcast %cst_73 : f32 to vector<16x1xf32>
    %214 = arith.divf %212, %213 : vector<16x1xf32>
    %215 = vector.broadcast %214 : vector<16x1xf32> to vector<16x32xf32>
    %216 = arith.subf %210, %215 : vector<16x32xf32>
    %217 = arith.mulf %216, %216 : vector<16x32xf32>
    %cst_74 = arith.constant dense<0.000000e+00> : vector<16xf32>
    %218 = vector.multi_reduction <add>, %217, %cst_74 [1] : vector<16x32xf32> to vector<16xf32>
    %219 = vector.shape_cast %218 : vector<16xf32> to vector<16x1xf32>
    %cst_75 = arith.constant 3.200000e+01 : f32
    %220 = vector.broadcast %cst_75 : f32 to vector<16x1xf32>
    %221 = arith.divf %219, %220 : vector<16x1xf32>
    %222 = vector.broadcast %214 : vector<16x1xf32> to vector<16x32xf32>
    %223 = arith.subf %210, %222 : vector<16x32xf32>
    %cst_76 = arith.constant 9.99999996E-13 : f32
    %224 = vector.broadcast %cst_76 : f32 to vector<16x1xf32>
    %225 = arith.addf %221, %224 : vector<16x1xf32>
    %226 = math.rsqrt %225 : vector<16x1xf32>
    %227 = vector.broadcast %226 : vector<16x1xf32> to vector<16x32xf32>
    %228 = arith.mulf %223, %227 : vector<16x32xf32>
    %229 = vector.broadcast %43 : vector<1x32xf32> to vector<16x32xf32>
    %230 = arith.mulf %228, %229 : vector<16x32xf32>
    %231 = vector.broadcast %44 : vector<1x32xf32> to vector<16x32xf32>
    %232 = arith.addf %230, %231 : vector<16x32xf32>
    %c49 = arith.constant 49 : index
    %c0_77 = arith.constant 0 : index
    %233 = vector.load %arg3[%c49, %c0_77] : memref<64x128xf32, #tpu.memory_space<vmem>>, vector<1x128xf32>
    %c50 = arith.constant 50 : index
    %c0_78 = arith.constant 0 : index
    %234 = vector.load %arg3[%c50, %c0_78] : memref<64x128xf32, #tpu.memory_space<vmem>>, vector<1x32xf32>
    %c51 = arith.constant 51 : index
    %c0_79 = arith.constant 0 : index
    %235 = vector.load %arg3[%c51, %c0_79] : memref<64x128xf32, #tpu.memory_space<vmem>>, vector<1x32xf32>
    %c52 = arith.constant 52 : index
    %c0_80 = arith.constant 0 : index
    %236 = vector.load %arg3[%c52, %c0_80] : memref<64x128xf32, #tpu.memory_space<vmem>>, vector<1x32xf32>
    %c53 = arith.constant 53 : index
    %c0_81 = arith.constant 0 : index
    %237 = vector.load %arg3[%c53, %c0_81] : memref<64x128xf32, #tpu.memory_space<vmem>>, vector<1x64xf32>
    %c54 = arith.constant 54 : index
    %c0_82 = arith.constant 0 : index
    %238 = vector.load %arg3[%c54, %c0_82] : memref<64x128xf32, #tpu.memory_space<vmem>>, vector<1x32xf32>
    %c55 = arith.constant 55 : index
    %c0_83 = arith.constant 0 : index
    %239 = vector.load %arg3[%c55, %c0_83] : memref<64x128xf32, #tpu.memory_space<vmem>>, vector<1x32xf32>
    %c56 = arith.constant 56 : index
    %c0_84 = arith.constant 0 : index
    %240 = vector.load %arg3[%c56, %c0_84] : memref<64x128xf32, #tpu.memory_space<vmem>>, vector<1x32xf32>
    %241 = arith.truncf %232 : vector<16x32xf32> to vector<16x32xbf16>
    %c1_85 = arith.constant 1 : index
    %c0_86 = arith.constant 0 : index
    %c0_87 = arith.constant 0 : index
    %242 = vector.load %arg4[%c1_85, %c0_86, %c0_87] : memref<3x32x128xbf16, #tpu.memory_space<vmem>>, vector<1x32x128xbf16>
    %243 = vector.shape_cast %242 : vector<1x32x128xbf16> to vector<32x128xbf16>
    %cst_88 = arith.constant dense<0.000000e+00> : vector<16x128xf32>
    %244 = tpu.matmul %241, %243, %cst_88 {dimension_numbers = #tpu.dot_dimension_numbers<[1], [0], [0], [1], [0, 0, 1, 1], [], []>} : vector<16x32xbf16>, vector<32x128xbf16>, vector<16x128xf32> -> vector<16x128xf32>
    %245 = vector.broadcast %233 : vector<1x128xf32> to vector<16x128xf32>
    %246 = arith.addf %244, %245 : vector<16x128xf32>
    %247 = vector.extract_strided_slice %246 {offsets = [0, 0], sizes = [16, 32], strides = [1, 1]} : vector<16x128xf32> to vector<16x32xf32>
    %248 = arith.truncf %247 : vector<16x32xf32> to vector<16x32xbf16>
    %249 = vector.extract_strided_slice %246 {offsets = [0, 32], sizes = [16, 32], strides = [1, 1]} : vector<16x128xf32> to vector<16x32xf32>
    %250 = vector.extract_strided_slice %246 {offsets = [0, 64], sizes = [16, 32], strides = [1, 1]} : vector<16x128xf32> to vector<16x32xf32>
    %cst_89 = arith.constant 0.000000e+00 : f32
    %251 = vector.broadcast %cst_89 : f32 to vector<16x32xf32>
    %252 = vector.extract_strided_slice %35 {offsets = [0, 0], sizes = [1, 32], strides = [1, 1]} : vector<4x32xf32> to vector<1x32xf32>
    %253 = vector.broadcast %252 : vector<1x32xf32> to vector<16x32xf32>
    %254 = arith.mulf %249, %253 : vector<16x32xf32>
    %255 = arith.truncf %254 : vector<16x32xf32> to vector<16x32xbf16>
    %256 = vector.broadcast %252 : vector<1x32xf32> to vector<16x32xf32>
    %257 = arith.mulf %250, %256 : vector<16x32xf32>
    %258 = arith.truncf %257 : vector<16x32xf32> to vector<16x32xbf16>
    %cst_90 = arith.constant dense<0.000000e+00> : vector<16x16xf32>
    %259 = tpu.matmul %248, %255, %cst_90 {dimension_numbers = #tpu.dot_dimension_numbers<[1], [1], [0], [0], [0, 0, 1, 0], [], []>} : vector<16x32xbf16>, vector<16x32xbf16>, vector<16x16xf32> -> vector<16x16xf32>
    %cst_91 = arith.constant 0.353553385 : f32
    %260 = vector.broadcast %cst_91 : f32 to vector<16x16xf32>
    %261 = arith.mulf %259, %260 : vector<16x16xf32>
    %262 = arith.addf %261, %36 : vector<16x16xf32>
    %cst_92 = arith.constant dense<0xFF800000> : vector<16xf32>
    %263 = vector.multi_reduction <maximumf>, %262, %cst_92 [1] : vector<16x16xf32> to vector<16xf32>
    %cst_93 = arith.constant 0xFF800000 : f32
    %264 = vector.broadcast %cst_93 : f32 to vector<16xf32>
    %265 = arith.maximumf %264, %263 : vector<16xf32>
    %266 = vector.shape_cast %265 : vector<16xf32> to vector<16x1xf32>
    %267 = vector.broadcast %266 : vector<16x1xf32> to vector<16x16xf32>
    %268 = arith.subf %262, %267 : vector<16x16xf32>
    %269 = math.exp %268 : vector<16x16xf32>
    %cst_94 = arith.constant dense<0.000000e+00> : vector<16xf32>
    %270 = vector.multi_reduction <add>, %269, %cst_94 [1] : vector<16x16xf32> to vector<16xf32>
    %271 = vector.shape_cast %270 : vector<16xf32> to vector<16x1xf32>
    %272 = vector.broadcast %271 : vector<16x1xf32> to vector<16x16xf32>
    %273 = arith.divf %269, %272 : vector<16x16xf32>
    %274 = arith.truncf %273 : vector<16x16xf32> to vector<16x16xbf16>
    %cst_95 = arith.constant dense<0.000000e+00> : vector<16x32xf32>
    %275 = tpu.matmul %274, %258, %cst_95 {dimension_numbers = #tpu.dot_dimension_numbers<[1], [0], [0], [1], [0, 0, 1, 1], [], []>} : vector<16x16xbf16>, vector<16x32xbf16>, vector<16x32xf32> -> vector<16x32xf32>
    %276 = arith.addf %251, %275 : vector<16x32xf32>
    %277 = vector.extract_strided_slice %35 {offsets = [1, 0], sizes = [1, 32], strides = [1, 1]} : vector<4x32xf32> to vector<1x32xf32>
    %278 = vector.broadcast %277 : vector<1x32xf32> to vector<16x32xf32>
    %279 = arith.mulf %249, %278 : vector<16x32xf32>
    %280 = arith.truncf %279 : vector<16x32xf32> to vector<16x32xbf16>
    %281 = vector.broadcast %277 : vector<1x32xf32> to vector<16x32xf32>
    %282 = arith.mulf %250, %281 : vector<16x32xf32>
    %283 = arith.truncf %282 : vector<16x32xf32> to vector<16x32xbf16>
    %cst_96 = arith.constant dense<0.000000e+00> : vector<16x16xf32>
    %284 = tpu.matmul %248, %280, %cst_96 {dimension_numbers = #tpu.dot_dimension_numbers<[1], [1], [0], [0], [0, 0, 1, 0], [], []>} : vector<16x32xbf16>, vector<16x32xbf16>, vector<16x16xf32> -> vector<16x16xf32>
    %cst_97 = arith.constant 0.353553385 : f32
    %285 = vector.broadcast %cst_97 : f32 to vector<16x16xf32>
    %286 = arith.mulf %284, %285 : vector<16x16xf32>
    %287 = arith.addf %286, %36 : vector<16x16xf32>
    %cst_98 = arith.constant dense<0xFF800000> : vector<16xf32>
    %288 = vector.multi_reduction <maximumf>, %287, %cst_98 [1] : vector<16x16xf32> to vector<16xf32>
    %cst_99 = arith.constant 0xFF800000 : f32
    %289 = vector.broadcast %cst_99 : f32 to vector<16xf32>
    %290 = arith.maximumf %289, %288 : vector<16xf32>
    %291 = vector.shape_cast %290 : vector<16xf32> to vector<16x1xf32>
    %292 = vector.broadcast %291 : vector<16x1xf32> to vector<16x16xf32>
    %293 = arith.subf %287, %292 : vector<16x16xf32>
    %294 = math.exp %293 : vector<16x16xf32>
    %cst_100 = arith.constant dense<0.000000e+00> : vector<16xf32>
    %295 = vector.multi_reduction <add>, %294, %cst_100 [1] : vector<16x16xf32> to vector<16xf32>
    %296 = vector.shape_cast %295 : vector<16xf32> to vector<16x1xf32>
    %297 = vector.broadcast %296 : vector<16x1xf32> to vector<16x16xf32>
    %298 = arith.divf %294, %297 : vector<16x16xf32>
    %299 = arith.truncf %298 : vector<16x16xf32> to vector<16x16xbf16>
    %cst_101 = arith.constant dense<0.000000e+00> : vector<16x32xf32>
    %300 = tpu.matmul %299, %283, %cst_101 {dimension_numbers = #tpu.dot_dimension_numbers<[1], [0], [0], [1], [0, 0, 1, 1], [], []>} : vector<16x16xbf16>, vector<16x32xbf16>, vector<16x32xf32> -> vector<16x32xf32>
    %301 = arith.addf %276, %300 : vector<16x32xf32>
    %302 = vector.extract_strided_slice %35 {offsets = [2, 0], sizes = [1, 32], strides = [1, 1]} : vector<4x32xf32> to vector<1x32xf32>
    %303 = vector.broadcast %302 : vector<1x32xf32> to vector<16x32xf32>
    %304 = arith.mulf %249, %303 : vector<16x32xf32>
    %305 = arith.truncf %304 : vector<16x32xf32> to vector<16x32xbf16>
    %306 = vector.broadcast %302 : vector<1x32xf32> to vector<16x32xf32>
    %307 = arith.mulf %250, %306 : vector<16x32xf32>
    %308 = arith.truncf %307 : vector<16x32xf32> to vector<16x32xbf16>
    %cst_102 = arith.constant dense<0.000000e+00> : vector<16x16xf32>
    %309 = tpu.matmul %248, %305, %cst_102 {dimension_numbers = #tpu.dot_dimension_numbers<[1], [1], [0], [0], [0, 0, 1, 0], [], []>} : vector<16x32xbf16>, vector<16x32xbf16>, vector<16x16xf32> -> vector<16x16xf32>
    %cst_103 = arith.constant 0.353553385 : f32
    %310 = vector.broadcast %cst_103 : f32 to vector<16x16xf32>
    %311 = arith.mulf %309, %310 : vector<16x16xf32>
    %312 = arith.addf %311, %36 : vector<16x16xf32>
    %cst_104 = arith.constant dense<0xFF800000> : vector<16xf32>
    %313 = vector.multi_reduction <maximumf>, %312, %cst_104 [1] : vector<16x16xf32> to vector<16xf32>
    %cst_105 = arith.constant 0xFF800000 : f32
    %314 = vector.broadcast %cst_105 : f32 to vector<16xf32>
    %315 = arith.maximumf %314, %313 : vector<16xf32>
    %316 = vector.shape_cast %315 : vector<16xf32> to vector<16x1xf32>
    %317 = vector.broadcast %316 : vector<16x1xf32> to vector<16x16xf32>
    %318 = arith.subf %312, %317 : vector<16x16xf32>
    %319 = math.exp %318 : vector<16x16xf32>
    %cst_106 = arith.constant dense<0.000000e+00> : vector<16xf32>
    %320 = vector.multi_reduction <add>, %319, %cst_106 [1] : vector<16x16xf32> to vector<16xf32>
    %321 = vector.shape_cast %320 : vector<16xf32> to vector<16x1xf32>
    %322 = vector.broadcast %321 : vector<16x1xf32> to vector<16x16xf32>
    %323 = arith.divf %319, %322 : vector<16x16xf32>
    %324 = arith.truncf %323 : vector<16x16xf32> to vector<16x16xbf16>
    %cst_107 = arith.constant dense<0.000000e+00> : vector<16x32xf32>
    %325 = tpu.matmul %324, %308, %cst_107 {dimension_numbers = #tpu.dot_dimension_numbers<[1], [0], [0], [1], [0, 0, 1, 1], [], []>} : vector<16x16xbf16>, vector<16x32xbf16>, vector<16x32xf32> -> vector<16x32xf32>
    %326 = arith.addf %301, %325 : vector<16x32xf32>
    %327 = vector.extract_strided_slice %35 {offsets = [3, 0], sizes = [1, 32], strides = [1, 1]} : vector<4x32xf32> to vector<1x32xf32>
    %328 = vector.broadcast %327 : vector<1x32xf32> to vector<16x32xf32>
    %329 = arith.mulf %249, %328 : vector<16x32xf32>
    %330 = arith.truncf %329 : vector<16x32xf32> to vector<16x32xbf16>
    %331 = vector.broadcast %327 : vector<1x32xf32> to vector<16x32xf32>
    %332 = arith.mulf %250, %331 : vector<16x32xf32>
    %333 = arith.truncf %332 : vector<16x32xf32> to vector<16x32xbf16>
    %cst_108 = arith.constant dense<0.000000e+00> : vector<16x16xf32>
    %334 = tpu.matmul %248, %330, %cst_108 {dimension_numbers = #tpu.dot_dimension_numbers<[1], [1], [0], [0], [0, 0, 1, 0], [], []>} : vector<16x32xbf16>, vector<16x32xbf16>, vector<16x16xf32> -> vector<16x16xf32>
    %cst_109 = arith.constant 0.353553385 : f32
    %335 = vector.broadcast %cst_109 : f32 to vector<16x16xf32>
    %336 = arith.mulf %334, %335 : vector<16x16xf32>
    %337 = arith.addf %336, %36 : vector<16x16xf32>
    %cst_110 = arith.constant dense<0xFF800000> : vector<16xf32>
    %338 = vector.multi_reduction <maximumf>, %337, %cst_110 [1] : vector<16x16xf32> to vector<16xf32>
    %cst_111 = arith.constant 0xFF800000 : f32
    %339 = vector.broadcast %cst_111 : f32 to vector<16xf32>
    %340 = arith.maximumf %339, %338 : vector<16xf32>
    %341 = vector.shape_cast %340 : vector<16xf32> to vector<16x1xf32>
    %342 = vector.broadcast %341 : vector<16x1xf32> to vector<16x16xf32>
    %343 = arith.subf %337, %342 : vector<16x16xf32>
    %344 = math.exp %343 : vector<16x16xf32>
    %cst_112 = arith.constant dense<0.000000e+00> : vector<16xf32>
    %345 = vector.multi_reduction <add>, %344, %cst_112 [1] : vector<16x16xf32> to vector<16xf32>
    %346 = vector.shape_cast %345 : vector<16xf32> to vector<16x1xf32>
    %347 = vector.broadcast %346 : vector<16x1xf32> to vector<16x16xf32>
    %348 = arith.divf %344, %347 : vector<16x16xf32>
    %349 = arith.truncf %348 : vector<16x16xf32> to vector<16x16xbf16>
    %cst_113 = arith.constant dense<0.000000e+00> : vector<16x32xf32>
    %350 = tpu.matmul %349, %333, %cst_113 {dimension_numbers = #tpu.dot_dimension_numbers<[1], [0], [0], [1], [0, 0, 1, 1], [], []>} : vector<16x16xbf16>, vector<16x32xbf16>, vector<16x32xf32> -> vector<16x32xf32>
    %351 = arith.addf %326, %350 : vector<16x32xf32>
    %352 = arith.truncf %351 : vector<16x32xf32> to vector<16x32xbf16>
    %c1_114 = arith.constant 1 : index
    %c0_115 = arith.constant 0 : index
    %c0_116 = arith.constant 0 : index
    %353 = vector.load %arg5[%c1_114, %c0_115, %c0_116] : memref<2x32x32xbf16, #tpu.memory_space<vmem>>, vector<1x32x32xbf16>
    %354 = vector.shape_cast %353 : vector<1x32x32xbf16> to vector<32x32xbf16>
    %cst_117 = arith.constant dense<0.000000e+00> : vector<16x32xf32>
    %355 = tpu.matmul %352, %354, %cst_117 {dimension_numbers = #tpu.dot_dimension_numbers<[1], [0], [0], [1], [0, 0, 1, 1], [], []>} : vector<16x32xbf16>, vector<32x32xbf16>, vector<16x32xf32> -> vector<16x32xf32>
    %356 = vector.broadcast %234 : vector<1x32xf32> to vector<16x32xf32>
    %357 = arith.addf %355, %356 : vector<16x32xf32>
    %358 = arith.addf %232, %357 : vector<16x32xf32>
    %cst_118 = arith.constant dense<0.000000e+00> : vector<16xf32>
    %359 = vector.multi_reduction <add>, %358, %cst_118 [1] : vector<16x32xf32> to vector<16xf32>
    %360 = vector.shape_cast %359 : vector<16xf32> to vector<16x1xf32>
    %cst_119 = arith.constant 3.200000e+01 : f32
    %361 = vector.broadcast %cst_119 : f32 to vector<16x1xf32>
    %362 = arith.divf %360, %361 : vector<16x1xf32>
    %363 = vector.broadcast %362 : vector<16x1xf32> to vector<16x32xf32>
    %364 = arith.subf %358, %363 : vector<16x32xf32>
    %365 = arith.mulf %364, %364 : vector<16x32xf32>
    %cst_120 = arith.constant dense<0.000000e+00> : vector<16xf32>
    %366 = vector.multi_reduction <add>, %365, %cst_120 [1] : vector<16x32xf32> to vector<16xf32>
    %367 = vector.shape_cast %366 : vector<16xf32> to vector<16x1xf32>
    %cst_121 = arith.constant 3.200000e+01 : f32
    %368 = vector.broadcast %cst_121 : f32 to vector<16x1xf32>
    %369 = arith.divf %367, %368 : vector<16x1xf32>
    %370 = vector.broadcast %362 : vector<16x1xf32> to vector<16x32xf32>
    %371 = arith.subf %358, %370 : vector<16x32xf32>
    %cst_122 = arith.constant 9.99999996E-13 : f32
    %372 = vector.broadcast %cst_122 : f32 to vector<16x1xf32>
    %373 = arith.addf %369, %372 : vector<16x1xf32>
    %374 = math.rsqrt %373 : vector<16x1xf32>
    %375 = vector.broadcast %374 : vector<16x1xf32> to vector<16x32xf32>
    %376 = arith.mulf %371, %375 : vector<16x32xf32>
    %377 = vector.broadcast %235 : vector<1x32xf32> to vector<16x32xf32>
    %378 = arith.mulf %376, %377 : vector<16x32xf32>
    %379 = vector.broadcast %236 : vector<1x32xf32> to vector<16x32xf32>
    %380 = arith.addf %378, %379 : vector<16x32xf32>
    %381 = arith.truncf %380 : vector<16x32xf32> to vector<16x32xbf16>
    %c1_123 = arith.constant 1 : index
    %c0_124 = arith.constant 0 : index
    %c0_125 = arith.constant 0 : index
    %382 = vector.load %arg6[%c1_123, %c0_124, %c0_125] : memref<2x32x64xbf16, #tpu.memory_space<vmem>>, vector<1x32x64xbf16>
    %383 = vector.shape_cast %382 : vector<1x32x64xbf16> to vector<32x64xbf16>
    %cst_126 = arith.constant dense<0.000000e+00> : vector<16x64xf32>
    %384 = tpu.matmul %381, %383, %cst_126 {dimension_numbers = #tpu.dot_dimension_numbers<[1], [0], [0], [1], [0, 0, 1, 1], [], []>} : vector<16x32xbf16>, vector<32x64xbf16>, vector<16x64xf32> -> vector<16x64xf32>
    %385 = vector.broadcast %237 : vector<1x64xf32> to vector<16x64xf32>
    %386 = arith.addf %384, %385 : vector<16x64xf32>
    %387 = arith.mulf %386, %386 : vector<16x64xf32>
    %388 = arith.mulf %386, %387 : vector<16x64xf32>
    %cst_127 = arith.constant 4.471500e-02 : f32
    %389 = vector.broadcast %cst_127 : f32 to vector<16x64xf32>
    %390 = arith.mulf %389, %388 : vector<16x64xf32>
    %391 = arith.addf %386, %390 : vector<16x64xf32>
    %cst_128 = arith.constant 0.797884583 : f32
    %392 = vector.broadcast %cst_128 : f32 to vector<16x64xf32>
    %393 = arith.mulf %392, %391 : vector<16x64xf32>
    %394 = math.tanh %393 : vector<16x64xf32>
    %cst_129 = arith.constant 1.000000e+00 : f32
    %395 = vector.broadcast %cst_129 : f32 to vector<16x64xf32>
    %396 = arith.addf %395, %394 : vector<16x64xf32>
    %cst_130 = arith.constant 5.000000e-01 : f32
    %397 = vector.broadcast %cst_130 : f32 to vector<16x64xf32>
    %398 = arith.mulf %397, %396 : vector<16x64xf32>
    %399 = arith.mulf %386, %398 : vector<16x64xf32>
    %400 = arith.truncf %399 : vector<16x64xf32> to vector<16x64xbf16>
    %c1_131 = arith.constant 1 : index
    %c0_132 = arith.constant 0 : index
    %c0_133 = arith.constant 0 : index
    %401 = vector.load %arg7[%c1_131, %c0_132, %c0_133] : memref<2x64x32xbf16, #tpu.memory_space<vmem>>, vector<1x64x32xbf16>
    %402 = vector.shape_cast %401 : vector<1x64x32xbf16> to vector<64x32xbf16>
    %cst_134 = arith.constant dense<0.000000e+00> : vector<16x32xf32>
    %403 = tpu.matmul %400, %402, %cst_134 {dimension_numbers = #tpu.dot_dimension_numbers<[1], [0], [0], [1], [0, 0, 1, 1], [], []>} : vector<16x64xbf16>, vector<64x32xbf16>, vector<16x32xf32> -> vector<16x32xf32>
    %404 = vector.broadcast %238 : vector<1x32xf32> to vector<16x32xf32>
    %405 = arith.addf %403, %404 : vector<16x32xf32>
    %406 = arith.addf %380, %405 : vector<16x32xf32>
    %cst_135 = arith.constant dense<0.000000e+00> : vector<16xf32>
    %407 = vector.multi_reduction <add>, %406, %cst_135 [1] : vector<16x32xf32> to vector<16xf32>
    %408 = vector.shape_cast %407 : vector<16xf32> to vector<16x1xf32>
    %cst_136 = arith.constant 3.200000e+01 : f32
    %409 = vector.broadcast %cst_136 : f32 to vector<16x1xf32>
    %410 = arith.divf %408, %409 : vector<16x1xf32>
    %411 = vector.broadcast %410 : vector<16x1xf32> to vector<16x32xf32>
    %412 = arith.subf %406, %411 : vector<16x32xf32>
    %413 = arith.mulf %412, %412 : vector<16x32xf32>
    %cst_137 = arith.constant dense<0.000000e+00> : vector<16xf32>
    %414 = vector.multi_reduction <add>, %413, %cst_137 [1] : vector<16x32xf32> to vector<16xf32>
    %415 = vector.shape_cast %414 : vector<16xf32> to vector<16x1xf32>
    %cst_138 = arith.constant 3.200000e+01 : f32
    %416 = vector.broadcast %cst_138 : f32 to vector<16x1xf32>
    %417 = arith.divf %415, %416 : vector<16x1xf32>
    %418 = vector.broadcast %410 : vector<16x1xf32> to vector<16x32xf32>
    %419 = arith.subf %406, %418 : vector<16x32xf32>
    %cst_139 = arith.constant 9.99999996E-13 : f32
    %420 = vector.broadcast %cst_139 : f32 to vector<16x1xf32>
    %421 = arith.addf %417, %420 : vector<16x1xf32>
    %422 = math.rsqrt %421 : vector<16x1xf32>
    %423 = vector.broadcast %422 : vector<16x1xf32> to vector<16x32xf32>
    %424 = arith.mulf %419, %423 : vector<16x32xf32>
    %425 = vector.broadcast %239 : vector<1x32xf32> to vector<16x32xf32>
    %426 = arith.mulf %424, %425 : vector<16x32xf32>
    %427 = vector.broadcast %240 : vector<1x32xf32> to vector<16x32xf32>
    %428 = arith.addf %426, %427 : vector<16x32xf32>
    %c3 = arith.constant 3 : index
    %c0_140 = arith.constant 0 : index
    %429 = vector.load %arg3[%c3, %c0_140] : memref<64x128xf32, #tpu.memory_space<vmem>>, vector<2x16xf32>
    %430 = arith.truncf %429 : vector<2x16xf32> to vector<2x16xbf16>
    %431 = arith.truncf %428 : vector<16x32xf32> to vector<16x32xbf16>
    %cst_141 = arith.constant dense<0.000000e+00> : vector<2x32xf32>
    %432 = tpu.matmul %430, %431, %cst_141 {dimension_numbers = #tpu.dot_dimension_numbers<[1], [0], [0], [1], [0, 0, 1, 1], [], []>} : vector<2x16xbf16>, vector<16x32xbf16>, vector<2x32xf32> -> vector<2x32xf32>
    %433 = arith.truncf %432 : vector<2x32xf32> to vector<2x32xbf16>
    %c2 = arith.constant 2 : index
    %c0_142 = arith.constant 0 : index
    %c0_143 = arith.constant 0 : index
    %434 = vector.load %arg4[%c2, %c0_142, %c0_143] : memref<3x32x128xbf16, #tpu.memory_space<vmem>>, vector<1x32x128xbf16>
    %435 = vector.shape_cast %434 : vector<1x32x128xbf16> to vector<32x128xbf16>
    %cst_144 = arith.constant dense<0.000000e+00> : vector<2x128xf32>
    %436 = tpu.matmul %433, %435, %cst_144 {dimension_numbers = #tpu.dot_dimension_numbers<[1], [0], [0], [1], [0, 0, 1, 1], [], []>} : vector<2x32xbf16>, vector<32x128xbf16>, vector<2x128xf32> -> vector<2x128xf32>
    %c2_145 = arith.constant 2 : index
    %c0_146 = arith.constant 0 : index
    %437 = vector.load %arg3[%c2_145, %c0_146] : memref<64x128xf32, #tpu.memory_space<vmem>>, vector<1x128xf32>
    %438 = vector.broadcast %437 : vector<1x128xf32> to vector<2x128xf32>
    %439 = arith.addf %436, %438 : vector<2x128xf32>
    %c0_147 = arith.constant 0 : index
    %c0_148 = arith.constant 0 : index
    %440 = vector.load %arg8[%c0_147, %c0_148] : memref<2x128xf32, #tpu.memory_space<vmem>>, vector<2x128xf32>
    tpu.vector_store %arg8[%c0_147, %c0_148], %439 {strides = array<i32>} : memref<2x128xf32, #tpu.memory_space<vmem>>, vector<2x128xf32>,
    return
  }
  func.func @transform_0(%arg0: i32) -> (i32, i32) {
    %c0_i32 = arith.constant 0 : i32
    %c0_i32_0 = arith.constant 0 : i32
    %c0_i32_1 = arith.constant 0 : i32
    return %c0_i32, %c0_i32_0 : i32, i32
  }
  func.func @transform_1(%arg0: i32) -> (i32, i32) {
    %c0_i32 = arith.constant 0 : i32
    %c0_i32_0 = arith.constant 0 : i32
    %c0_i32_1 = arith.constant 0 : i32
    return %c0_i32, %c0_i32_0 : i32, i32
  }
  func.func @transform_2(%arg0: i32) -> (i32, i32) {
    %c0_i32 = arith.constant 0 : i32
    %c0_i32_0 = arith.constant 0 : i32
    %c0_i32_1 = arith.constant 0 : i32
    return %c0_i32, %c0_i32_0 : i32, i32
  }
  func.func @transform_3(%arg0: i32) -> (i32, i32, i32) {
    %c0_i32 = arith.constant 0 : i32
    %c0_i32_0 = arith.constant 0 : i32
    %c0_i32_1 = arith.constant 0 : i32
    %c0_i32_2 = arith.constant 0 : i32
    return %c0_i32, %c0_i32_0, %c0_i32_1 : i32, i32, i32
  }
  func.func @transform_4(%arg0: i32) -> (i32, i32, i32) {
    %c0_i32 = arith.constant 0 : i32
    %c0_i32_0 = arith.constant 0 : i32
    %c0_i32_1 = arith.constant 0 : i32
    %c0_i32_2 = arith.constant 0 : i32
    return %c0_i32, %c0_i32_0, %c0_i32_1 : i32, i32, i32
  }
  func.func @transform_5(%arg0: i32) -> (i32, i32, i32) {
    %c0_i32 = arith.constant 0 : i32
    %c0_i32_0 = arith.constant 0 : i32
    %c0_i32_1 = arith.constant 0 : i32
    %c0_i32_2 = arith.constant 0 : i32
    return %c0_i32, %c0_i32_0, %c0_i32_1 : i32, i32, i32
  }
  func.func @transform_6(%arg0: i32) -> (i32, i32, i32) {
    %c0_i32 = arith.constant 0 : i32
    %c0_i32_0 = arith.constant 0 : i32
    %c0_i32_1 = arith.constant 0 : i32
    %c0_i32_2 = arith.constant 0 : i32
    return %c0_i32, %c0_i32_0, %c0_i32_1 : i32, i32, i32
  }
  func.func @transform_7(%arg0: i32) -> (i32, i32) {
    %c0_i32 = arith.constant 0 : i32
    %c0_i32_0 = arith.constant 0 : i32
    %c0_i32_1 = arith.constant 0 : i32
    return %c0_i32, %c0_i32_0 : i32, i32
  }
}

</mosaic_0001>

<bundles_post_ra>
// kernel: encode_and_classify.1
= control target key start
LH: loop header
LB: loop body
LE: loop exit
PB: predicated region body
PF: predicated region fallthrough
CT: control target
= control target key end

     0   :  { %v3497_v0 = vmov 0   ;;  %v29_v36 = vlaneseq  ;;  %v3498_v47 = vmov 1.0|1.0   ;;  %v3499_v49 = vmov 0.0   ;;  %s3501_s19 = smov 32   ;;  %s3502_s26 = smov 96   ;;  %s4361_s0 = inlined_call_operand.vmem [shape: s32[16,1], index: 0, kind: input, shape index: {}]   ;;  %s4362_s1 = inlined_call_operand.vmem [shape: bf16[1000,32], index: 1, kind: input, shape index: {}]   ;;  %s4363_s2 = inlined_call_operand.vmem [shape: f32[64,128], index: 2, kind: input, shape index: {}]   ;;  %s4364_s3 = inlined_call_operand.vmem [shape: bf16[3,32,128], index: 3, kind: input, shape index: {}]   ;;  %s4365_s4 = inlined_call_operand.vmem [shape: bf16[2,32,32], index: 4, kind: input, shape index: {}]   ;;  %s4366_s5 = inlined_call_operand.vmem [shape: bf16[2,32,64], index: 5, kind: input, shape index: {}]   ;;  %s4367_s6 = inlined_call_operand.vmem [shape: bf16[2,64,32], index: 6, kind: input, shape index: {}]   ;;  %s4368_s7 = inlined_call_operand.vmem [shape: f32[2,128], index: 7, kind: output, shape index: {}]  }
   0x1   :  { %3319 = vset.pattern.permute.xlu0 %v3497_v0  ;;  %v27_v1 = vld [vmem:[%s4361_s0] sm:$0xff]  ;;  %v28_v2 = vld [vmem:[%s4361_s0 + $0x8] sm:$0xff]  ;;  %v3328_v11 = vld [vmem:[%s4362_s1 + $0x50] sm:$0xff]   ;;  %s3503_s27 = smov 64  }
   0x2   :  { %39 = vperm.xlu0 %3319, %v27_v1   ;;  %v3320_v3 = vld [vmem:[%s4362_s1 + $0x40] sm:$0xff]   ;;  %v3324_v7 = vld [vmem:[%s4362_s1 + $0x48] sm:$0xff]   ;;  %v3329_v12 = vld [vmem:[%s4362_s1 + $0xd0] sm:$0xff]   ;;  %v3652_v37 = vand.u32 127, %v29_v36 }
   0x3   :  { %v3321_v4 = vld [vmem:[%s4362_s1 + $0xc0] sm:$0xff]   ;;  %2975 = vmatprep.subr.bf16.mxu0 %v3320_v3  ;;  %v3325_v8 = vld [vmem:[%s4362_s1 + $0xc8] sm:$0xff]   ;;  %v3330_v13 = vld [vmem:[%s4362_s1 + $0x10] sm:$0xff]  }
   0x4   :  { %v3322_v5 = vld [vmem:[%s4362_s1] sm:$0xff]   ;;  %2997 = vmatprep.subr.bf16.mxu1 %v3321_v4  ;;  %v3326_v9 = vld [vmem:[%s4362_s1 + $0x8] sm:$0xff]   ;;  %v3331_v14 = vld [vmem:[%s4362_s1 + $0x90] sm:$0xff]   ;;  %v36_v38 = vadd.s32 768, %v3652_v37  ;;  %v37_v40 = vadd.s32 896, %v3652_v37  ;;  %v31_v41 = vadd.s32 128, %v3652_v37 }
   0x5   :  { %v3323_v6 = vld [vmem:[%s4362_s1 + $0x80] sm:$0xff]   ;;  %2976 = vmatpush3.bf16.msra.mxu0 %v3322_v5  ;;  %v3327_v10 = vld [vmem:[%s4362_s1 + $0x88] sm:$0xff]   ;;  %v3332_v15 = vld [vmem:[%s4362_s1 + $0x58] sm:$0xff]   ;;  %v33_v42 = vadd.s32 384, %v3652_v37  ;;  %v32_v43 = vadd.s32 256, %v3652_v37  ;;  %v35_v45 = vadd.s32 640, %v3652_v37 }
   0x6   :  { %42 = vperm.xlu0 %3319, %v28_v2   ;;  %2998 = vmatpush3.bf16.msra.mxu1 %v3323_v6  ;;  %v3333_v16 = vld [vmem:[%s4362_s1 + $0xd8] sm:$0xff]   ;;  %v3336_v19 = vld [vmem:[%s4362_s1 + $0x60] sm:$0xff]   ;;  %v3340_v23 = vld [vmem:[%s4362_s1 + $0x68] sm:$0xff]  }
   0x7   :  { %2977 = vmatprep.subr.bf16.mxu0 %v3324_v7  ;;  %2999 = vmatprep.subr.bf16.mxu1 %v3325_v8  ;;  %v3334_v17 = vld [vmem:[%s4362_s1 + $0x18] sm:$0xff]   ;;  %v3337_v20 = vld [vmem:[%s4362_s1 + $0xe0] sm:$0xff]   ;;  %v3341_v24 = vld [vmem:[%s4362_s1 + $0xe8] sm:$0xff]  }
   0x8   :  { %v3335_v18 = vld [vmem:[%s4362_s1 + $0x98] sm:$0xff]   ;;  %v3338_v21 = vld [vmem:[%s4362_s1 + $0x20] sm:$0xff]   ;;  %v3342_v25 = vld [vmem:[%s4362_s1 + $0x28] sm:$0xff]  }
   0x9   :  { %2978 = vmatpush3.bf16.msra.mxu0 %v3326_v9  ;;  %v3339_v22 = vld [vmem:[%s4362_s1 + $0xa0] sm:$0xff]   ;;  %v3343_v26 = vld [vmem:[%s4362_s1 + $0xa8] sm:$0xff]   ;;  %v3344_v27 = vld [vmem:[%s4362_s1 + $0x70] sm:$0xff]  }
   0xa   :  { %3000 = vmatpush3.bf16.msra.mxu1 %v3327_v10  ;;  %2979 = vmatprep.subr.bf16.mxu0 %v3328_v11  ;;  %v3345_v28 = vld [vmem:[%s4362_s1 + $0xf0] sm:$0xff]   ;;  %v3348_v31 = vld [vmem:[%s4362_s1 + $0x78] sm:$0xff]   ;;  %v3352_v35 = vld [vmem:[%s4362_s1 + $0x140] sm:$0xff]  }
   0xb   :  { %3001 = vmatprep.subr.bf16.mxu1 %v3329_v12  ;;  %v3346_v29 = vld [vmem:[%s4362_s1 + $0x30] sm:$0xff]   ;;  %v3349_v32 = vld [vmem:[%s4362_s1 + $0xf8] sm:$0xff]   ;;  %v3353_v46 = vld [vmem:[%s4362_s1 + $0x100] sm:$0xff]   ;;  %v34_v12 = vadd.s32 512, %v3652_v37 }
   0xc   :  { %v3347_v30 = vld [vmem:[%s4362_s1 + $0xb0] sm:$0xff]   ;;  %v3350_v33 = vld [vmem:[%s4362_s1 + $0x38] sm:$0xff]   ;;  %v3354_v48 = vld [vmem:[%s4362_s1 + $0x180] sm:$0xff]  }
   0xd   :  { %2980 = vmatpush3.bf16.msra.mxu0 %v3330_v13  ;;  %v3351_v34 = vld [vmem:[%s4362_s1 + $0xb8] sm:$0xff]   ;;  %v3355_v53 = vld [vmem:[%s4362_s1 + $0x148] sm:$0xff]   ;;  %v3358_v56 = vld [vmem:[%s4362_s1 + $0x150] sm:$0xff]  }
   0xe   :  { %3002 = vmatpush3.bf16.msra.mxu1 %v3331_v14  ;;  %2981 = vmatprep.subr.bf16.mxu0 %v3332_v15  ;;  %v3356_v54 = vld [vmem:[%s4362_s1 + $0x108] sm:$0xff]   ;;  %v3359_v58 = vld [vmem:[%s4362_s1 + $0x110] sm:$0xff]   ;;  %v3361_v60 = vld [vmem:[%s4362_s1 + $0x158] sm:$0xff]  }
   0xf   :  { %3003 = vmatprep.subr.bf16.mxu1 %v3333_v16  ;;  %v3357_v55 = vld [vmem:[%s4362_s1 + $0x188] sm:$0xff]   ;;  %v3360_v59 = vld [vmem:[%s4362_s1 + $0x190] sm:$0xff]   ;;  %v3362_v61 = vld [vmem:[%s4362_s1 + $0x118] sm:$0xff]  }
  0x10   :  { %v3363_v62 = vld [vmem:[%s4362_s1 + $0x198] sm:$0xff]   ;;  %v3364_v63 = vld [vmem:[%s4362_s1 + $0x160] sm:$0xff]   ;;  %v3367_v3 = vld [vmem:[%s4362_s1 + $0x168] sm:$0xff]  }
  0x11   :  { %2982 = vmatpush3.bf16.msra.mxu0 %v3334_v17  ;;  %v3365_v1 = vld [vmem:[%s4362_s1 + $0x120] sm:$0xff]   ;;  %v3368_v4 = vld [vmem:[%s4362_s1 + $0x128] sm:$0xff]   ;;  %v3370_v6 = vld [vmem:[%s4362_s1 + $0x170] sm:$0xff]  }
  0x12   :  { %3004 = vmatpush3.bf16.msra.mxu1 %v3335_v18  ;;  %2983 = vmatprep.subr.bf16.mxu0 %v3336_v19  ;;  %v3366_v2 = vld [vmem:[%s4362_s1 + $0x1a0] sm:$0xff]   ;;  %v3369_v5 = vld [vmem:[%s4362_s1 + $0x1a8] sm:$0xff]   ;;  %v3371_v7 = vld [vmem:[%s4362_s1 + $0x130] sm:$0xff]  }
  0x13   :  { %3005 = vmatprep.subr.bf16.mxu1 %v3337_v20  ;;  %v3372_v8 = vld [vmem:[%s4362_s1 + $0x1b0] sm:$0xff]   ;;  %v3373_v9 = vld [vmem:[%s4362_s1 + $0x178] sm:$0xff]   ;;  %v3376_v13 = vld [vmem:[%s4362_s1 + $0x1c0] sm:$0xff]  }
  0x14   :  { %v3374_v10 = vld [vmem:[%s4362_s1 + $0x138] sm:$0xff]   ;;  %v3377_v14 = vld [vmem:[%s4362_s1 + $0x1c8] sm:$0xff]   ;;  %v3378_v15 = vld [vmem:[%s4362_s1 + $0x1d0] sm:$0xff]  }
  0x15   :  { %2984 = vmatpush3.bf16.msra.mxu0 %v3338_v21  ;;  %v3375_v11 = vld [vmem:[%s4362_s1 + $0x1b8] sm:$0xff]   ;;  %v3380_v17 = vld [vmem:[%s4362_s1 + $0x1e0] sm:$0xff]   ;;  %v3381_v18 = vld [vmem:[%s4362_s1 + $0x1e8] sm:$0xff]  }
  0x16   :  { %3006 = vmatpush3.bf16.msra.mxu1 %v3339_v22  ;;  %2985 = vmatprep.subr.bf16.mxu0 %v3340_v23  ;;  %v3379_v16 = vld [vmem:[%s4362_s1 + $0x1d8] sm:$0xff]   ;;  %v3382_v19 = vld [vmem:[%s4362_s1 + $0x1f0] ss:$0 sps:$4 sm:$0xff]   ;;  %v225_v23 = vld [vmem:[%s4363_s2 + $0x5] sm:$0xff] }
  0x17   :  { %3007 = vmatprep.subr.bf16.mxu1 %v3341_v24 }
  0x19   :  { %2986 = vmatpush3.bf16.msra.mxu0 %v3342_v25 }
  0x1a   :  { %3008 = vmatpush3.bf16.msra.mxu1 %v3343_v26  ;;  %2987 = vmatprep.subr.bf16.mxu0 %v3344_v27 }
  0x1b   :  { %3009 = vmatprep.subr.bf16.mxu1 %v3345_v28 }
  0x1d   :  { %2988 = vmatpush3.bf16.msra.mxu0 %v3346_v29  ;;  %v226_v29 = vld [vmem:[%s4363_s2 + $0xd] sm:$0xff] }
  0x1e   :  { %3010 = vmatpush3.bf16.msra.mxu1 %v3347_v30  ;;  %2989 = vmatprep.subr.bf16.mxu0 %v3348_v31 }
  0x1f   :  { %3011 = vmatprep.subr.bf16.mxu1 %v3349_v32 }
  0x21   :  { %2990 = vmatpush3.bf16.msra.mxu0 %v3350_v33 }
  0x22   :  { %3012 = vmatpush3.bf16.msra.mxu1 %v3351_v34  ;;  %3019 = vmatprep.subr.bf16.mxu0 %v3352_v35 }
  0x23   :  { %733 = vmatprep.subr.bf16.mxu1 %v3497_v0 }
  0x81   :  { %v3655_v39 = vpop.permute.xlu0 %39 }
  0x82   :  { %vm50_vm0 = vcmp.eq.s32.totalorder %v3655_v39, %v36_v38  ;;  %vm51_vm1 = vcmp.eq.s32.totalorder %v3655_v39, %v37_v40  ;;  %vm45_vm2 = vcmp.eq.s32.totalorder %v3655_v39, %v31_v41  ;;  %vm47_vm7 = vcmp.eq.s32.totalorder %v3655_v39, %v33_v42 }
  0x83   :  { %vm44_vm11 = vcmp.eq.s32.totalorder %v3655_v39, %v3652_v37  ;;  %v2797_v50 = vsel %vm51_vm1, 1.0, %v3499_v49  ;;  %vm46_vm14 = vcmp.eq.s32.totalorder %v3655_v39, %v32_v43  ;;  %vm49_vm1 = vcmp.eq.s32.totalorder %v3655_v39, %v35_v45 }
  0x85   :  { %v3662_v44 = vpop.permute.xlu0 %42 }
  0x86   :  { %vm53_vm3 = vcmp.eq.s32.totalorder %v3662_v44, %v31_v41  ;;  %vm55_vm4 = vcmp.eq.s32.totalorder %v3662_v44, %v33_v42  ;;  %vm52_vm5 = vcmp.eq.s32.totalorder %v3662_v44, %v3652_v37  ;;  %vm54_vm8 = vcmp.eq.s32.totalorder %v3662_v44, %v32_v43 }
  0x87   :  { %vm2869_vm6 = vmpackc.low %vm53_vm3, %vm45_vm2  ;;  %vm59_vm9 = vcmp.eq.s32.totalorder %v3662_v44, %v37_v40  ;;  %vm57_vm12 = vcmp.eq.s32.totalorder %v3662_v44, %v35_v45  ;;  %vm602_vm2 = vcmask 850944   ;;  %vm58_vm3 = vcmp.eq.s32.totalorder %v3662_v44, %v36_v38 }
  0x88   :  { %2870 = vmatprep.mubr.msk.bf16.mxu0 %vm2869_vm6, %v3498_v47  ;;  %vm2873_vm10 = vmpackc.low %vm55_vm4, %vm47_vm7  ;;  %v2805_v51 = vsel %vm59_vm9, 1.0, %v3499_v49  ;;  %vm48_vm6 = vcmp.eq.s32.totalorder %v3655_v39, %v34_v12  ;;  %vm776_vm9 = vcmask 261120  }
  0x89   :  { %2874 = vmatprep.mubr.msk.bf16.mxu1 %vm2873_vm10, %v3498_v47  ;;  %vm2871_vm13 = vmpackc.low %vm52_vm5, %vm44_vm11  ;;  %v99_v52 = vpack.c.bf16 %v2805_v51, %v2797_v50  ;;  %vm3500_vm10 = vmmov 0   ;;  %vm964_vm11 = vcmask 130048  }
  0x8a   :  { %2872 = vmatmul.mubr.msk.bf16.vlgmr.msra.gmra.mrb[0].mxu0 %vm2871_vm13, %v3498_v47  ;;  %vm2875_vm15 = vmpackc.low %vm54_vm8, %vm46_vm14  ;;  %vm606_vm8 = vcmask 1043456  }
  0x8b   :  { %2876 = vmatmul.mubr.msk.bf16.vlgmr.msra.gmra.mrb[0].mxu1 %vm2875_vm15, %v3498_v47  ;;  %3020 = vmatpush3.bf16.msra.mxu0 %v3353_v46  ;;  %vm2877_vm4 = vmpackc.low %vm57_vm12, %vm49_vm1  ;;  %v608_v20 = vsel %vm606_vm8, %v3382_v19, 0  ;;  %vm1682_vm12 = vcmask 523264  }
  0x8c   :  { %734 = vmatpush1.bf16.msra.mxu1 %v3354_v48  ;;  %2878 = vmatprep.mubr.msk.bf16.mxu0 %vm2877_vm4, %v3498_v47  ;;  %vm3716_vm5 = vmpackc.low %vm58_vm3, %vm50_vm0  ;;  %vm56_vm0 = vcmp.eq.s32.totalorder %v3662_v44, %v34_v12 }
  0x8d   :  { %2881 = vmatprep.mubr.msk.bf16.mxu1 %vm602_vm2, %v99_v52  ;;  %3021 = vmatprep.subr.bf16.mxu0 %v3355_v53  ;;  %vm2879_vm7 = vmpackc.low %vm56_vm0, %vm48_vm6 }
  0x8e   :  { %735 = vmatprep.subr.bf16.mxu1 %v3497_v0 }
  0x8f   :  { %3022 = vmatpush3.bf16.msra.mxu0 %v3356_v54 }
  0x90   :  { %736 = vmatpush1.bf16.msra.mxu1 %v3357_v55  ;;  %3023 = vmatprep.subr.bf16.mxu0 %v3358_v56 }
  0x91   :  { %737 = vmatprep.subr.bf16.mxu1 %v3497_v0 }
  0x93   :  { %3024 = vmatpush3.bf16.msra.mxu0 %v3359_v58 }
  0x94   :  { %738 = vmatpush1.bf16.msra.mxu1 %v3360_v59  ;;  %3025 = vmatprep.subr.bf16.mxu0 %v3361_v60 }
  0x95   :  { %739 = vmatprep.subr.bf16.mxu1 %v3497_v0 }
  0x97   :  { %3026 = vmatpush3.bf16.msra.mxu0 %v3362_v61 }
  0x98   :  { %740 = vmatpush1.bf16.msra.mxu1 %v3363_v62  ;;  %3027 = vmatprep.subr.bf16.mxu0 %v3364_v63 }
  0x99   :  { %741 = vmatprep.subr.bf16.mxu1 %v3497_v0 }
  0x9b   :  { %3028 = vmatpush3.bf16.msra.mxu0 %v3365_v1 }
  0x9c   :  { %742 = vmatpush1.bf16.msra.mxu1 %v3366_v2  ;;  %3029 = vmatprep.subr.bf16.mxu0 %v3367_v3  ;;  %v3383_v3 = vld [vmem:[%s4364_s3] sm:$0xff]  }
  0x9d   :  { %743 = vmatprep.subr.bf16.mxu1 %v3497_v0 }
  0x9f   :  { %3030 = vmatpush3.bf16.msra.mxu0 %v3368_v4  ;;  %v3384_v4 = vld [vmem:[%s4364_s3 + $0x8] sm:$0xff]  }
  0xa0   :  { %744 = vmatpush1.bf16.msra.mxu1 %v3369_v5  ;;  %3031 = vmatprep.subr.bf16.mxu0 %v3370_v6  ;;  %v894_v5 = vshrl.u32 %v29_v36, 7  ;;  %v816_v6 = vld [vmem:[%s4363_s2 + $0x15] sm:$0xf] }
  0xa1   :  { %745 = vmatprep.subr.bf16.mxu1 %v3497_v0 }
  0xa3   :  { %3032 = vmatpush3.bf16.msra.mxu0 %v3371_v7  ;;  %v895_v7 = vsub.s32 0, %v894_v5 }
  0xa4   :  { %746 = vmatpush1.bf16.msra.mxu1 %v3372_v8  ;;  %3033 = vmatprep.subr.bf16.mxu0 %v3373_v9  ;;  %v990_v8 = vsub.s32 1, %v894_v5 }
  0xa5   :  { %747 = vmatprep.subr.bf16.mxu1 %v3497_v0  ;;  %v3841_v9 = vrot.slane %v816_v6, %v895_v7 }
  0xa7   :  { %3034 = vmatpush3.bf16.msra.mxu0 %v3374_v10  ;;  %v991_v10 = vrot.slane %v816_v6, %v990_v8 }
  0xa8   :  { %748 = vmatpush1.bf16.msra.mxu1 %v3375_v11  ;;  %3106 = vmatprep.subr.bf16.mxu0 %v3499_v49  ;;  %v1177_v11 = vsub.s32 2, %v894_v5 }
  0xa9   :  { %749 = vmatprep.subr.bf16.mxu1 %v3497_v0 }
  0xaa   :  { %2880 = vmatmul.mubr.msk.bf16.vlgmr.msra.gmra.mrb[4].mxu0 %vm2879_vm7, %v3498_v47  ;;  %v3844_v12 = vrot.slane %v816_v6, %v1177_v11 }
  0xab   :  { %3110 = vmatprep.mubr.msk.bf16.mxu0 %vm3500_vm10, %v3499_v49  ;;  %3107 = vmatpush3.bf16.msra.mxu0 %v3383_v3 }
  0xac   :  { %750 = vmatpush1.bf16.msra.mxu1 %v3376_v13  ;;  %3108 = vmatprep.subr.bf16.mxu0 %v3499_v49  ;;  %v1318_v13 = vsub.s32 3, %v894_v5 }
  0xad   :  { %751 = vmatprep.subr.bf16.mxu1 %v3497_v0 }
  0xae   :  { %v3847_v36 = vrot.slane %v816_v6, %v1318_v13  ;;  %v3931_v6 = vld [vmem:[%s4363_s2 + $0x21] sm:$0xff] }
  0xaf   :  { %3109 = vmatpush3.bf16.msra.mxu0 %v3384_v4 }
  0xb0   :  { %752 = vmatpush1.bf16.msra.mxu1 %v3377_v14  ;;  %3114 = vmatprep.subr.bf16.mxu0 %v3499_v49 }
  0xb1   :  { %753 = vmatprep.subr.bf16.mxu1 %v3497_v0 }
  0xb4   :  { %754 = vmatpush1.bf16.msra.mxu1 %v3378_v15 }
  0xb5   :  { %755 = vmatprep.subr.bf16.mxu1 %v3497_v0 }
  0xb8   :  { %756 = vmatpush1.bf16.msra.mxu1 %v3379_v16 }
  0xb9   :  { %757 = vmatprep.subr.bf16.mxu1 %v3497_v0 }
  0xbc   :  { %758 = vmatpush1.bf16.msra.mxu1 %v3380_v17 }
  0xbd   :  { %759 = vmatprep.subr.bf16.mxu1 %v3497_v0 }
  0xc0   :  { %760 = vmatpush1.bf16.msra.mxu1 %v3381_v18 }
  0xc1   :  { %761 = vmatprep.subr.bf16.mxu1 %v3497_v0 }
  0xc4   :  { %762 = vmatpush1.bf16.msra.mxu1 %v608_v20 }
  0xc5   :  { %3138 = vmatprep.subr.bf16.mxu1 %v3499_v49 }
  0xc7   :  { %2883 = vmatmul.mubr.msk.bf16.vlgmr.msra.gmra.mrb[4].mxu1 %vm3716_vm5, %v3498_v47 }
  0xc8   :  { %3140 = vmatprep.mubr.msk.bf16.mxu1 %vm3500_vm10, %v3499_v49 }
 0x15d   :  { %v2991_v21 = vpop.f32.mrb[0].mxu0 }
 0x15e   :  { %v3013_v22 = vpop.f32.mrb[0].mxu1  ;;  %v2992_v24 = vpop.f32.mrb[1].mxu0 }
 0x15f   :  { %v2993_v25 = vadd.f32 %v2992_v24, %v2991_v21  ;;  %v3014_v26 = vpop.f32.mrb[1].mxu1  ;;  %v2994_v27 = vpop.f32.mrb[2].mxu0 }
 0x160   :  { %v3015_v28 = vadd.f32 %v3014_v26, %v3013_v22  ;;  %v3016_v0 = vpop.f32.mrb[2].mxu1  ;;  %v2995_v30 = vpop.f32.mrb[3].mxu0  ;;  %v2884_v22 = vld [vmem:[%s4363_s2] ss:$0 sm:$0xff]  ;;  %v2885_v26 = vld [vmem:[%s4363_s2 + $0x1] ss:$0 sm:$0xff] }
 0x161   :  { %v645_v31 = vadd.f32 %v2993_v25, %v225_v23  ;;  %v2996_v32 = vadd.f32 %v2995_v30, %v2994_v27  ;;  %v3017_v33 = vpop.f32.mrb[3].mxu1 }
 0x162   :  { %v3018_v34 = vadd.f32 %v3017_v33, %v3016_v0 }
 0x163   :  { %v686_v35 = vadd.f32 %v3015_v28, %v645_v31  ;;  %v648_v37 = vadd.f32 %v2996_v32, %v226_v29  ;;  %v2886_v32 = vld [vmem:[%s4363_s2 + $0x29] ss:$0 sm:$0xff] }
 0x165   :  { %v689_v38 = vadd.f32 %v3018_v34, %v648_v37 }
 0x17d   :  { %v3035_v39 = vpop.f32.mrb[4].mxu0 }
 0x17e   :  { %v3036_v40 = vpop.f32.mrb[5].mxu0 }
 0x17f   :  { %v3037_v41 = vadd.f32 %v3036_v40, %v3035_v39  ;;  %v3038_v42 = vpop.f32.mrb[6].mxu0 }
 0x180   :  { %v3039_v43 = vpop.f32.mrb[7].mxu0 }
 0x181   :  { %v3040_v44 = vadd.f32 %v3039_v43, %v3038_v42  ;;  %v727_v45 = vadd.f32 %v3037_v41, %v686_v35 }
 0x183   :  { %v730_v46 = vadd.f32 %v3040_v44, %v689_v38 }
 0x19a   :  { %v767_v47 = vpop.f32.mrb[4].mxu1 }
 0x19b   :  { %v768_v48 = vadd.f32 %v767_v47, %v727_v45  ;;  %v769_v50 = vpop.f32.mrb[5].mxu1 }
 0x19c   :  { %v770_v51 = vpop.f32.mrb[6].mxu1 }
 0x19d   :  { %v771_v52 = vadd.f32 %v770_v51, %v730_v46  ;;  %v772_v53 = vpop.f32.mrb[7].mxu1  ;;  %v777_v54 = vsel %vm776_vm9, %v768_v48, 0.0 }
 0x19e   :  { %778 = vadd.xlane.f32.xlu1 %v777_v54 }
 0x19f   :  { %v780_v55 = vsel %vm776_vm9, %v771_v52, 0.0 }
 0x1a2   :  { %781 = vadd.xlane.f32.xlu1 %v780_v55 }
 0x22b   :  { %v779_v56 = vpop.xlane.xlu1 %778 }
 0x22c   :  { %v784_v57 = vmul.f32 0.03125, %v779_v56 }
 0x22e   :  { %v786_v58 = vsub.f32 %v768_v48, %v784_v57 }
 0x22f   :  { %v782_v59 = vpop.xlane.xlu1 %781 }
 0x230   :  { %v785_v60 = vmul.f32 0.03125, %v782_v59  ;;  %v788_v61 = vmul.f32 %v786_v58, %v786_v58 }
 0x232   :  { %v787_v62 = vsub.f32 %v771_v52, %v785_v60  ;;  %v790_v63 = vsel %vm776_vm9, %v788_v61, 0.0 }
 0x233   :  { %791 = vadd.xlane.f32.xlu0 %v790_v63 }
 0x234   :  { %v789_v1 = vmul.f32 %v787_v62, %v787_v62 }
 0x236   :  { %v793_v2 = vsel %vm776_vm9, %v789_v1, 0.0 }
 0x237   :  { %794 = vadd.xlane.f32.xlu1 %v793_v2  ;;  %v3926_v2 = vld [vmem:[%s4363_s2 + $0x19] sm:$0xff] }
 0x248   :  { %898 = vrot.lane.b32.xlu1 %v3841_v9, %s3501_s19 }
 0x24c   :  { %993 = vrot.lane.b32.xlu1 %v991_v10, %s3501_s19 }
 0x250   :  { %1180 = vrot.lane.b32.xlu1 %v3844_v12, %s3501_s19 }
 0x254   :  { %1321 = vrot.lane.b32.xlu1 %v3847_v36, %s3501_s19 }
 0x2c0   :  { %v792_v14 = vpop.xlane.xlu0 %791 }
 0x2c1   :  { %v796_v15 = vmul.f32 0.03125, %v792_v14 }
 0x2c3   :  { %v798_v16 = vadd.f32 1e-12, %v796_v15 }
 0x2c4   :  { %v795_v17 = vpop.xlane.xlu1 %794 }
 0x2c5   :  { %3405 = vrsqrt.f32 %v798_v16  ;;  %v797_v18 = vmul.f32 0.03125, %v795_v17 }
 0x2c7   :  { %v799_v19 = vadd.f32 1e-12, %v797_v18 }
 0x2c8   :  { %v3865_v30 = vpop.permute.xlu1 %898 }
 0x2c9   :  { %3407 = vrsqrt.f32 %v799_v19 }
 0x2cc   :  { %v3867_v31 = vpop.permute.xlu1 %993 }
 0x2cf   :  { %v3406_v20 = vpop.eup %3405 }
 0x2d0   :  { %v802_v21 = vmul.f32 %v3406_v20, %v786_v58  ;;  %v3876_v40 = vpop.permute.xlu1 %1180 }
 0x2d2   :  { %v808_v24 = vmul.f32 %v2884_v22, %v802_v21 }
 0x2d3   :  { %v3408_v23 = vpop.eup %3407 }
 0x2d4   :  { %v803_v25 = vmul.f32 %v3408_v23, %v787_v62  ;;  %v3856_v28 = vadd.f32 %v2885_v26, %v808_v24  ;;  %v3892_v50 = vpop.permute.xlu1 %1321 }
 0x2d6   :  { %v809_v27 = vmul.f32 %v2884_v22, %v803_v25 }
 0x2d8   :  { %v3858_v0 = vadd.f32 %v2885_v26, %v809_v27 }
 0x2da   :  { %v827_v29 = vpack.c.bf16 %v3858_v0, %v3856_v28 }
 0x2dc   :  { %3111 = vmatmul.mubr.msk.bf16.vlgmr.msra.gmra.mrb[8].mxu0 %vm776_vm9, %v827_v29 }
 0x2dd   :  { %3116 = vmatprep.mubr.msk.bf16.mxu0 %vm3500_vm10, %v3499_v49 }
 0x3af   :  { %v885_v33 = vpop.f32.mrb[8].mxu0 }
 0x3b0   :  { %v3872_v34 = vadd.f32 %v2886_v32, %v885_v33  ;;  %v3112_v35 = vpop.f32.mrb[9].mxu0 }
 0x3b1   :  { %v888_v37 = vpop.f32.mrb[10].mxu0 }
 0x3b2   :  { %v3874_v38 = vadd.f32 %v2886_v32, %v888_v37  ;;  %v3113_v39 = vpop.f32.mrb[11].mxu0  ;;  %v901_v41 = vmul.f32 %v3865_v30, %v3872_v34  ;;  %v996_v43 = vmul.f32 %v3867_v31, %v3872_v34  ;;  %v1183_v48 = vmul.f32 %v3876_v40, %v3872_v34 }
 0x3b3   :  { %v1324_v53 = vmul.f32 %v3892_v50, %v3872_v34 }
 0x3b4   :  { %v902_v42 = vmul.f32 %v3865_v30, %v3874_v38  ;;  %v997_v44 = vmul.f32 %v3867_v31, %v3874_v38  ;;  %v1184_v47 = vmul.f32 %v3876_v40, %v3874_v38  ;;  %v1325_v51 = vmul.f32 %v3892_v50, %v3874_v38 }
 0x3b5   :  { %v892_v60 = vpack.c.bf16 %v3874_v38, %v3872_v34 }
 0x3b6   :  { %v903_v45 = vpack.c.bf16 %v902_v42, %v901_v41  ;;  %v998_v46 = vpack.c.bf16 %v997_v44, %v996_v43  ;;  %v1185_v52 = vpack.c.bf16 %v1184_v47, %v1183_v48  ;;  %v1326_v54 = vpack.c.bf16 %v1325_v51, %v1324_v53 }
 0x3b8   :  { %911 = vrot.lane.b32.xlu0 %v903_v45, %s3502_s26  ;;  %1006 = vrot.lane.b32.xlu1 %v998_v46, %s3502_s26 }
 0x3bc   :  { %1193 = vrot.lane.b32.xlu1 %v1185_v52, %s3502_s26 }
 0x3c0   :  { %1334 = vrot.lane.b32.xlu1 %v1326_v54, %s3502_s26 }
 0x3c4   :  { %999 = vrot.lane.b32.xlu1 %v991_v10, %s3503_s27 }
 0x42a   :  { %v912_v55 = vpop.permute.xlu0 %911  ;;  %v1007_v56 = vpop.permute.xlu1 %1006 }
 0x42b   :  { %v917_v57 = vsel %vm776_vm9, %v912_v55, 0  ;;  %v1009_v61 = vsel %vm776_vm9, %v1007_v56, 0 }
 0x42c   :  { %3115 = vmatpush3.bf16.xpose.msra.mxu0 %v917_v57 }
 0x42d   :  { %3120 = vmatprep.subr.bf16.mxu0 %v3499_v49 }
 0x42e   :  { %v1194_v58 = vpop.permute.xlu1 %1193 }
 0x42f   :  { %v1196_v59 = vsel %vm776_vm9, %v1194_v58, 0 }
 0x430   :  { %3139 = vmatpush3.bf16.xpose.msra.mxu1 %v1196_v59 }
 0x431   :  { %3150 = vmatprep.subr.bf16.mxu1 %v3499_v49 }
 0x432   :  { %v1335_v62 = vpop.permute.xlu1 %1334 }
 0x433   :  { %3117 = vmatmul.mubr.msk.bf16.vlgmr.msra.gmra.mrb[12].mxu0 %vm776_vm9, %v892_v60  ;;  %v1337_v63 = vsel %vm776_vm9, %v1335_v62, 0 }
 0x434   :  { %3121 = vmatpush3.bf16.xpose.msra.mxu0 %v1009_v61  ;;  %3122 = vmatprep.mubr.msk.bf16.mxu0 %vm3500_vm10, %v3499_v49 }
 0x435   :  { %3126 = vmatprep.subr.bf16.mxu0 %v3499_v49 }
 0x436   :  { %v3953_v54 = vpop.permute.xlu1 %999 }
 0x437   :  { %3141 = vmatmul.mubr.msk.bf16.vlgmr.msra.gmra.mrb[8].mxu1 %vm776_vm9, %v892_v60 }
 0x438   :  { %3151 = vmatpush3.bf16.xpose.msra.mxu1 %v1337_v63  ;;  %3152 = vmatprep.mubr.msk.bf16.mxu1 %vm3500_vm10, %v3499_v49 }
 0x439   :  { %3162 = vmatprep.subr.bf16.mxu1 %v3499_v49 }
 0x43b   :  { %3123 = vmatmul.mubr.msk.bf16.vlgmr.msra.gmra.mrb[16].mxu0 %vm776_vm9, %v892_v60 }
 0x43c   :  { %3128 = vmatprep.mubr.msk.bf16.mxu0 %vm3500_vm10, %v3499_v49 }
 0x43f   :  { %3153 = vmatmul.mubr.msk.bf16.vlgmr.msra.gmra.mrb[12].mxu1 %vm776_vm9, %v892_v60 }
 0x440   :  { %3166 = vmatprep.mubr.msk.bf16.mxu1 %vm3500_vm10, %v3499_v49 }
 0x506   :  { %v953_v1 = vpop.f32.mrb[12].mxu0 }
 0x507   :  { %v960_v3 = vmul.f32 0.35355338, %v953_v1  ;;  %v3118_v4 = vpop.f32.mrb[13].mxu0 }
 0x508   :  { %v956_v5 = vpop.f32.mrb[14].mxu0 }
 0x509   :  { %v961_v7 = vmul.f32 0.35355338, %v956_v5  ;;  %v3119_v8 = vpop.f32.mrb[15].mxu0  ;;  %v962_v10 = vadd.f32 %v960_v3, %v3926_v2 }
 0x50a   :  { %v1232_v11 = vpop.f32.mrb[8].mxu1 }
 0x50b   :  { %v1239_v13 = vmul.f32 0.35355338, %v1232_v11  ;;  %v3142_v14 = vpop.f32.mrb[9].mxu1  ;;  %v965_v15 = vsel %vm964_vm11, %v962_v10, -inf  ;;  %v963_v16 = vadd.f32 %v961_v7, %v3931_v6 }
 0x50c   :  { %966 = vmax.xlane.f32.xlu1 %v965_v15  ;;  %v1235_v17 = vpop.f32.mrb[10].mxu1 }
 0x50d   :  { %v1240_v18 = vmul.f32 0.35355338, %v1235_v17  ;;  %v3143_v19 = vpop.f32.mrb[11].mxu1  ;;  %v968_v20 = vsel %vm964_vm11, %v963_v16, -inf  ;;  %v1241_v21 = vadd.f32 %v1239_v13, %v3926_v2 }
 0x50e   :  { %969 = vmax.xlane.f32.xlu0 %v968_v20  ;;  %v1045_v22 = vpop.f32.mrb[16].mxu0 }
 0x50f   :  { %v1052_v23 = vmul.f32 0.35355338, %v1045_v22  ;;  %v3124_v24 = vpop.f32.mrb[17].mxu0  ;;  %v1243_v25 = vsel %vm964_vm11, %v1241_v21, -inf  ;;  %v1242_v26 = vadd.f32 %v1240_v18, %v3931_v6 }
 0x510   :  { %v1048_v27 = vpop.f32.mrb[18].mxu0  ;;  %1244 = vmax.xlane.f32.xlu1 %v1243_v25  ;;  %v1002_v24 = vmul.f32 %v3953_v54, %v3872_v34  ;;  %v1003_v25 = vmul.f32 %v3953_v54, %v3874_v38 }
 0x511   :  { %v1053_v29 = vmul.f32 0.35355338, %v1048_v27  ;;  %v3125_v32 = vpop.f32.mrb[19].mxu0  ;;  %v1246_v33 = vsel %vm964_vm11, %v1242_v26, -inf  ;;  %v1054_v35 = vadd.f32 %v1052_v23, %v3926_v2 }
 0x512   :  { %1247 = vmax.xlane.f32.xlu0 %v1246_v33  ;;  %v1373_v37 = vpop.f32.mrb[12].mxu1  ;;  %v1004_v27 = vpack.c.bf16 %v1003_v25, %v1002_v24 }
 0x513   :  { %v1380_v39 = vmul.f32 0.35355338, %v1373_v37  ;;  %v3154_v41 = vpop.f32.mrb[13].mxu1  ;;  %v1056_v42 = vsel %vm964_vm11, %v1054_v35, -inf  ;;  %v1055_v43 = vadd.f32 %v1053_v29, %v3931_v6 }
 0x514   :  { %1057 = vmax.xlane.f32.xlu1 %v1056_v42  ;;  %v1376_v44 = vpop.f32.mrb[14].mxu1 }
 0x515   :  { %v1381_v45 = vmul.f32 0.35355338, %v1376_v44  ;;  %v3155_v46 = vpop.f32.mrb[15].mxu1  ;;  %v1059_v47 = vsel %vm964_vm11, %v1055_v43, -inf  ;;  %v1382_v48 = vadd.f32 %v1380_v39, %v3926_v2 }
 0x516   :  { %1060 = vmax.xlane.f32.xlu0 %v1059_v47 }
 0x517   :  { %v1384_v51 = vsel %vm964_vm11, %v1382_v48, -inf  ;;  %v1383_v52 = vadd.f32 %v1381_v45, %v3931_v6 }
 0x518   :  { %1385 = vmax.xlane.f32.xlu1 %v1384_v51 }
 0x519   :  { %v1387_v53 = vsel %vm964_vm11, %v1383_v52, -inf }
 0x51a   :  { %1388 = vmax.xlane.f32.xlu0 %v1387_v53 }
 0x529   :  { %1186 = vrot.lane.b32.xlu1 %v3844_v12, %s3503_s27 }
 0x530   :  { %904 = vrot.lane.b32.xlu0 %v3841_v9, %s3503_s27 }
 0x599   :  { %v967_v55 = vpop.xlane.xlu1 %966 }
 0x59a   :  { %v971_v58 = vsub.f32 %v962_v10, %v967_v55 }
 0x59b   :  { %v970_v56 = vpop.xlane.xlu0 %969 }
 0x59c   :  { %v973_v62 = vmul.f32 1.442695, %v971_v58  ;;  %v972_v1 = vsub.f32 %v963_v16, %v970_v56  ;;  %v3385_v56 = vld [vmem:[%s4365_s4] sm:$0xff]  }
 0x59d   :  { %v1245_v57 = vpop.xlane.xlu1 %1244  ;;  %3163 = vmatpush3.bf16.msra.mxu1 %v3385_v56 }
 0x59e   :  { %v975_v12 = vmul.f32 1.442695, %v972_v1  ;;  %v1249_v7 = vsub.f32 %v1241_v21, %v1245_v57  ;;  %3164 = vmatprep.subr.bf16.mxu1 %v3499_v49 }
 0x59f   :  { %v1248_v59 = vpop.xlane.xlu0 %1247 }
 0x5a0   :  { %v1251_v9 = vmul.f32 1.442695, %v1249_v7  ;;  %v1250_v8 = vsub.f32 %v1242_v26, %v1248_v59 }
 0x5a1   :  { %v1058_v60 = vpop.xlane.xlu1 %1057 }
 0x5a2   :  { %v1062_v61 = vsub.f32 %v1054_v35, %v1058_v60  ;;  %v1253_v10 = vmul.f32 1.442695, %v1250_v8 }
 0x5a3   :  { %v1061_v63 = vpop.xlane.xlu0 %1060 }
 0x5a4   :  { %v1064_v3 = vmul.f32 1.442695, %v1062_v61  ;;  %v1063_v4 = vsub.f32 %v1055_v43, %v1061_v63 }
 0x5a5   :  { %v1386_v26 = vpop.xlane.xlu1 %1385 }
 0x5a6   :  { %3409 = vpow2.f32 %v1064_v3  ;;  %v1066_v5 = vmul.f32 1.442695, %v1063_v4  ;;  %v1390_v29 = vsub.f32 %v1382_v48, %v1386_v26 }
 0x5a7   :  { %3411 = vpow2.f32 %v973_v62  ;;  %v1389_v33 = vpop.xlane.xlu0 %1388 }
 0x5a8   :  { %3413 = vpow2.f32 %v1066_v5  ;;  %v1392_v32 = vmul.f32 1.442695, %v1390_v29  ;;  %v1391_v35 = vsub.f32 %v1383_v52, %v1389_v33  ;;  %v3386_v29 = vld [vmem:[%s4365_s4 + $0x8] sm:$0xff]  }
 0x5a9   :  { %3415 = vpow2.f32 %v975_v12  ;;  %v4000_v47 = vpop.permute.xlu1 %1186  ;;  %3165 = vmatpush3.bf16.msra.mxu1 %v3386_v29 }
 0x5aa   :  { %3417 = vpow2.f32 %v1251_v9  ;;  %v1394_v39 = vmul.f32 1.442695, %v1391_v35  ;;  %v1189_v48 = vmul.f32 %v4000_v47, %v3872_v34  ;;  %v1190_v51 = vmul.f32 %v4000_v47, %v3874_v38  ;;  %3170 = vmatprep.subr.bf16.mxu1 %v3499_v49 }
 0x5ab   :  { %3419 = vpow2.f32 %v1253_v10  ;;  %v3992_v42 = vpop.permute.xlu0 %904 }
 0x5ac   :  { %3421 = vpow2.f32 %v1392_v32  ;;  %v907_v44 = vmul.f32 %v3992_v42, %v3872_v34  ;;  %v908_v45 = vmul.f32 %v3992_v42, %v3874_v38  ;;  %v1191_v52 = vpack.c.bf16 %v1190_v51, %v1189_v48 }
 0x5ad   :  { %3423 = vpow2.f32 %v1394_v39 }
 0x5ae   :  { %v909_v46 = vpack.c.bf16 %v908_v45, %v907_v44 }
 0x5b0   :  { %v3955_v11 = vpop.eup %3409 }
 0x5b1   :  { %v3957_v13 = vpop.eup %3411  ;;  %v1068_v14 = vsel %vm964_vm11, %v3955_v11, 0.0 }
 0x5b2   :  { %v3961_v15 = vpop.eup %3413  ;;  %1069 = vadd.xlane.f32.xlu1 %v1068_v14  ;;  %v977_v17 = vsel %vm964_vm11, %v3957_v13, 0.0 }
 0x5b3   :  { %v1071_v16 = vsel %vm964_vm11, %v3961_v15, 0.0  ;;  %v3967_v18 = vpop.eup %3415 }
 0x5b4   :  { %1072 = vadd.xlane.f32.xlu0 %v1071_v16  ;;  %v980_v19 = vsel %vm964_vm11, %v3967_v18, 0.0  ;;  %v3971_v20 = vpop.eup %3417 }
 0x5b5   :  { %v1255_v21 = vsel %vm964_vm11, %v3971_v20, 0.0  ;;  %v3975_v22 = vpop.eup %3419 }
 0x5b6   :  { %978 = vadd.xlane.f32.xlu1 %v977_v17  ;;  %v1258_v23 = vsel %vm964_vm11, %v3975_v22, 0.0  ;;  %v3986_v37 = vpop.eup %3421 }
 0x5b7   :  { %v3990_v41 = vpop.eup %3423 }
 0x5b8   :  { %v1399_v43 = vsel %vm964_vm11, %v3990_v41, 0.0 }
 0x5ba   :  { %981 = vadd.xlane.f32.xlu1 %v980_v19 }
 0x5be   :  { %1256 = vadd.xlane.f32.xlu1 %v1255_v21 }
 0x5c2   :  { %1259 = vadd.xlane.f32.xlu1 %v1258_v23 }
 0x5ca   :  { %1327 = vrot.lane.b32.xlu0 %v3847_v36, %s3503_s27  ;;  %v1396_v36 = vsel %vm964_vm11, %v3986_v37, 0.0 }
 0x5d3   :  { %1080 = vrot.lane.b32.xlu1 %v1004_v27, %s3503_s27 }
 0x5e9   :  { %1397 = vadd.xlane.f32.xlu0 %v1396_v36  ;;  %v2898_v36 = vld [vmem:[%s4363_s2 + $0x2a] ss:$0 sm:$0xff] }
 0x5f7   :  { %1400 = vadd.xlane.f32.xlu1 %v1399_v43 }
 0x5ff   :  { %1128 = vrot.lane.b32.xlu0 %v909_v46, %s3503_s27 }
 0x608   :  { %1267 = vrot.lane.b32.xlu1 %v1191_v52, %s3503_s27 }
 0x63f   :  { %v1070_v53 = vpop.xlane.xlu1 %1069 }
 0x641   :  { %v1073_v55 = vpop.xlane.xlu0 %1072 }
 0x642   :  { %3425 = vrcp.f32 %v1073_v55 }
 0x643   :  { %v979_v57 = vpop.xlane.xlu1 %978  ;;  %3427 = vrcp.f32 %v1070_v53 }
 0x645   :  { %v4012_v58 = vpop.permute.xlu0 %1327 }
 0x646   :  { %v1330_v59 = vmul.f32 %v4012_v58, %v3872_v34  ;;  %v1331_v60 = vmul.f32 %v4012_v58, %v3874_v38 }
 0x647   :  { %v982_v61 = vpop.xlane.xlu1 %981 }
 0x648   :  { %v1332_v62 = vpack.c.bf16 %v1331_v60, %v1330_v59  ;;  %3429 = vrcp.f32 %v982_v61 }
 0x649   :  { %3431 = vrcp.f32 %v979_v57 }
 0x64a   :  { %1408 = vrot.lane.b32.xlu0 %v1332_v62, %s3503_s27 }
 0x64b   :  { %v1257_v63 = vpop.xlane.xlu1 %1256 }
 0x64c   :  { %v3426_v1 = vpop.eup %3425 }
 0x64d   :  { %v3428_v4 = vpop.eup %3427  ;;  %v1077_v5 = vmul.f32 %v3426_v1, %v3961_v15 }
 0x64e   :  { %v1075_v12 = vmul.f32 %v3428_v4, %v3955_v11  ;;  %v3388_v4 = vld [vmem:[%s4366_s5 + $0x8] sm:$0xff]  }
 0x64f   :  { %v1260_v3 = vpop.xlane.xlu1 %1259 }
 0x650   :  { %v1078_v9 = vpack.c.bf16 %v1077_v5, %v1075_v12  ;;  %3433 = vrcp.f32 %v1260_v3 }
 0x651   :  { %3435 = vrcp.f32 %v1257_v63 }
 0x652   :  { %v3430_v34 = vpop.eup %3429 }
 0x653   :  { %v1081_v7 = vpop.permute.xlu1 %1080  ;;  %v3432_v8 = vpop.eup %3431  ;;  %v986_v10 = vmul.f32 %v3430_v34, %v3967_v18 }
 0x654   :  { %3127 = vmatpush3.bf16.msra.mxu0 %v1081_v7  ;;  %v984_v11 = vmul.f32 %v3432_v8, %v3957_v13 }
 0x655   :  { %3132 = vmatprep.subr.bf16.mxu0 %v3499_v49 }
 0x656   :  { %v987_v15 = vpack.c.bf16 %v986_v10, %v984_v11  ;;  %v2902_v11 = vld [vmem:[%s4363_s2 + $0x2b] ss:$0 sm:$0xff] }
 0x657   :  { %3129 = vmatmul.mubr.msk.bf16.vlgmr.msra.gmra.mrb[20].mxu0 %vm964_vm11, %v1078_v9 }
 0x658   :  { %3134 = vmatprep.mubr.msk.bf16.mxu0 %vm3500_vm10, %v3499_v49 }
 0x65a   :  { %v3434_v16 = vpop.eup %3433 }
 0x65b   :  { %v3436_v19 = vpop.eup %3435  ;;  %v1264_v21 = vmul.f32 %v3434_v16, %v3975_v22 }
 0x65c   :  { %v1262_v18 = vmul.f32 %v3436_v19, %v3971_v20 }
 0x65e   :  { %v1265_v13 = vpack.c.bf16 %v1264_v21, %v1262_v18 }
 0x676   :  { %v1398_v38 = vpop.xlane.xlu0 %1397 }
 0x67a   :  { %v1129_v14 = vpop.permute.xlu0 %1128 }
 0x67b   :  { %3133 = vmatpush3.bf16.msra.mxu0 %v1129_v14 }
 0x67c   :  { %3144 = vmatprep.subr.bf16.mxu0 %v3499_v49 }
 0x67e   :  { %3135 = vmatmul.mubr.msk.bf16.vlgmr.msra.gmra.mrb[20].mxu0 %vm964_vm11, %v987_v15 }
 0x67f   :  { %3146 = vmatprep.mubr.msk.bf16.mxu0 %vm3500_vm10, %v3499_v49 }
 0x684   :  { %v1401_v17 = vpop.xlane.xlu1 %1400 }
 0x685   :  { %3437 = vrcp.f32 %v1401_v17  ;;  %v2903_v17 = vld [vmem:[%s4363_s2 + $0x2c] ss:$0 sm:$0xff] }
 0x686   :  { %3439 = vrcp.f32 %v1398_v38 }
 0x688   :  { %v1268_v23 = vpop.permute.xlu1 %1267 }
 0x689   :  { %3145 = vmatpush3.bf16.msra.mxu0 %v1268_v23 }
 0x68a   :  { %3156 = vmatprep.subr.bf16.mxu0 %v3499_v49 }
 0x68c   :  { %3147 = vmatmul.mubr.msk.bf16.vlgmr.msra.gmra.mrb[20].mxu0 %vm964_vm11, %v1265_v13  ;;  %v3389_v13 = vld [vmem:[%s4367_s6] sm:$0xff]  }
 0x68d   :  { %3158 = vmatprep.mubr.msk.bf16.mxu0 %vm3500_vm10, %v3499_v49 }
 0x68f   :  { %v3438_v24 = vpop.eup %3437 }
 0x690   :  { %v3440_v25 = vpop.eup %3439  ;;  %v1405_v26 = vmul.f32 %v3438_v24, %v3990_v41  ;;  %v3390_v24 = vld [vmem:[%s4367_s6 + $0x8] sm:$0xff]  }
 0x691   :  { %v1403_v22 = vmul.f32 %v3440_v25, %v3986_v37  ;;  %v3391_v25 = vld [vmem:[%s4367_s6 + $0x10] sm:$0xff]  }
 0x693   :  { %v1406_v20 = vpack.c.bf16 %v1405_v26, %v1403_v22  ;;  %v3392_v26 = vld [vmem:[%s4367_s6 + $0x18] sm:$0xff]   ;;  %v2904_v22 = vld [vmem:[%s4363_s2 + $0x2d] ss:$0 sm:$0xff] }
 0x6bc   :  { %v1409_v27 = vpop.permute.xlu0 %1408 }
 0x6bd   :  { %3157 = vmatpush3.bf16.msra.mxu0 %v1409_v27 }
 0x6be   :  { %3178 = vmatprep.subr.bf16.mxu0 %v3499_v49 }
 0x6c0   :  { %3159 = vmatmul.mubr.msk.bf16.vlgmr.msra.gmra.mrb[20].mxu0 %vm964_vm11, %v1406_v20 }
 0x6c1   :  { %3186 = vmatprep.mubr.msk.bf16.mxu0 %vm3500_vm10, %v3499_v49  ;;  %3179 = vmatpush3.bf16.msra.mxu0 %v3389_v13 }
 0x6c2   :  { %3180 = vmatprep.subr.bf16.mxu0 %v3499_v49 }
 0x6c5   :  { %3181 = vmatpush3.bf16.msra.mxu0 %v3390_v24 }
 0x6c6   :  { %3182 = vmatprep.subr.bf16.mxu0 %v3499_v49 }
 0x6c9   :  { %3183 = vmatpush3.bf16.msra.mxu0 %v3391_v25 }
 0x6ca   :  { %3184 = vmatprep.subr.bf16.mxu0 %v3499_v49 }
 0x6cd   :  { %3185 = vmatpush3.bf16.msra.mxu0 %v3392_v26 }
 0x6ce   :  { %3204 = vmatprep.subr.bf16.mxu0 %v3499_v49 }
 0x793   :  { %v1448_v32 = vpop.f32.mrb[20].mxu0 }
 0x794   :  { %v3160_v33 = vpop.f32.mrb[21].mxu0 }
 0x795   :  { %v1451_v35 = vpop.f32.mrb[22].mxu0 }
 0x796   :  { %v1457_v37 = vpack.c.bf16 %v1451_v35, %v1448_v32  ;;  %v3161_v39 = vpop.f32.mrb[23].mxu0 }
 0x798   :  { %3167 = vmatmul.mubr.msk.bf16.vlgmr.msra.gmra.mrb[16].mxu1 %vm776_vm9, %v1457_v37 }
 0x799   :  { %3174 = vmatprep.mubr.msk.bf16.mxu1 %vm3500_vm10, %v3499_v49 }
 0x86b   :  { %v1515_v41 = vpop.f32.mrb[16].mxu1 }
 0x86c   :  { %v1516_v43 = vadd.f32 %v2898_v36, %v1515_v41  ;;  %v3168_v44 = vpop.f32.mrb[17].mxu1 }
 0x86d   :  { %v1518_v45 = vpop.f32.mrb[18].mxu1 }
 0x86e   :  { %v1519_v46 = vadd.f32 %v2898_v36, %v1518_v45  ;;  %v3169_v48 = vpop.f32.mrb[19].mxu1  ;;  %v1522_v51 = vadd.f32 %v1516_v43, %v3856_v28 }
 0x870   :  { %v1524_v52 = vsel %vm776_vm9, %v1522_v51, 0.0  ;;  %v1523_v53 = vadd.f32 %v1519_v46, %v3858_v0  ;;  %v3387_v0 = vld [vmem:[%s4366_s5] sm:$0xff]  }
 0x871   :  { %1525 = vadd.xlane.f32.xlu0 %v1524_v52  ;;  %3171 = vmatpush3.bf16.msra.mxu1 %v3387_v0 }
 0x872   :  { %v1527_v55 = vsel %vm776_vm9, %v1523_v53, 0.0  ;;  %3172 = vmatprep.subr.bf16.mxu1 %v3499_v49 }
 0x873   :  { %1528 = vadd.xlane.f32.xlu1 %v1527_v55 }
 0x875   :  { %3173 = vmatpush3.bf16.msra.mxu1 %v3388_v4 }
 0x876   :  { %3190 = vmatprep.subr.bf16.mxu1 %v3499_v49 }
 0x8fe   :  { %v1526_v56 = vpop.xlane.xlu0 %1525 }
 0x8ff   :  { %v1530_v57 = vmul.f32 0.03125, %v1526_v56 }
 0x900   :  { %v1529_v59 = vpop.xlane.xlu1 %1528 }
 0x901   :  { %v1532_v60 = vsub.f32 %v1522_v51, %v1530_v57  ;;  %v1531_v61 = vmul.f32 0.03125, %v1529_v59 }
 0x903   :  { %v1533_v62 = vsub.f32 %v1523_v53, %v1531_v61  ;;  %v1534_v63 = vmul.f32 %v1532_v60, %v1532_v60 }
 0x905   :  { %v1536_v1 = vsel %vm776_vm9, %v1534_v63, 0.0  ;;  %v1535_v3 = vmul.f32 %v1533_v62, %v1533_v62  ;;  %v2908_v63 = vld [vmem:[%s4363_s2 + $0x2e] ss:$0 sm:$0xff] }
 0x906   :  { %1537 = vadd.xlane.f32.xlu0 %v1536_v1 }
 0x907   :  { %v1539_v28 = vsel %vm776_vm9, %v1535_v3, 0.0 }
 0x90a   :  { %1540 = vadd.xlane.f32.xlu0 %v1539_v28 }
 0x993   :  { %v1538_v5 = vpop.xlane.xlu0 %1537 }
 0x994   :  { %v1542_v12 = vmul.f32 0.03125, %v1538_v5 }
 0x996   :  { %v1544_v7 = vadd.f32 1e-12, %v1542_v12 }
 0x997   :  { %v1541_v9 = vpop.xlane.xlu0 %1540 }
 0x998   :  { %3441 = vrsqrt.f32 %v1544_v7  ;;  %v1543_v34 = vmul.f32 0.03125, %v1541_v9 }
 0x99a   :  { %v1545_v38 = vadd.f32 1e-12, %v1543_v34 }
 0x99c   :  { %3443 = vrsqrt.f32 %v1545_v38 }
 0x9a2   :  { %v3442_v8 = vpop.eup %3441 }
 0x9a3   :  { %v1548_v10 = vmul.f32 %v3442_v8, %v1532_v60 }
 0x9a5   :  { %v1554_v15 = vmul.f32 %v2902_v11, %v1548_v10 }
 0x9a6   :  { %v3444_v14 = vpop.eup %3443 }
 0x9a7   :  { %v1549_v16 = vmul.f32 %v3444_v14, %v1533_v62  ;;  %v1560_v21 = vadd.f32 %v2903_v17, %v1554_v15 }
 0x9a9   :  { %v1555_v19 = vmul.f32 %v2902_v11, %v1549_v16 }
 0x9ab   :  { %v1561_v18 = vadd.f32 %v2903_v17, %v1555_v19 }
 0x9ad   :  { %v1562_v23 = vpack.c.bf16 %v1561_v18, %v1560_v21 }
 0x9af   :  { %3175 = vmatmul.mubr.msk.bf16.vlgmr.msra.gmra.mrb[20].mxu1 %vm776_vm9, %v1562_v23  ;;  %v3394_v23 = vld [vmem:[%s4364_s3 + $0x18] sm:$0xff]  }
 0x9b0   :  { %3194 = vmatprep.mubr.msk.bf16.mxu1 %vm3500_vm10, %v3499_v49 }
 0xa82   :  { %v1620_v27 = vpop.f32.mrb[20].mxu1 }
 0xa83   :  { %v1621_v20 = vadd.f32 %v2904_v22, %v1620_v27  ;;  %v3176_v29 = vpop.f32.mrb[21].mxu1 }
 0xa84   :  { %v1623_v32 = vpop.f32.mrb[22].mxu1 }
 0xa85   :  { %v1627_v33 = vmul.f32 %v1621_v20, %v1621_v20  ;;  %v1624_v35 = vadd.f32 %v2904_v22, %v1623_v32  ;;  %v3177_v37 = vpop.f32.mrb[23].mxu1  ;;  %v2914_v32 = vld [vmem:[%s4363_s2 + $0x2f] ss:$0 sm:$0xff] }
 0xa87   :  { %v1629_v39 = vmul.f32 %v1627_v33, %v1621_v20  ;;  %v1628_v36 = vmul.f32 %v1624_v35, %v1624_v35 }
 0xa89   :  { %v1631_v41 = vmul.f32 0.044715, %v1629_v39  ;;  %v1630_v43 = vmul.f32 %v1628_v36, %v1624_v35  ;;  %v2915_v39 = vld [vmem:[%s4363_s2 + $0x30] ss:$0 sm:$0xff] }
 0xa8b   :  { %v1633_v44 = vadd.f32 %v1631_v41, %v1621_v20  ;;  %v1632_v45 = vmul.f32 0.044715, %v1630_v43 }
 0xa8d   :  { %v1635_v46 = vmul.f32 0.7978846, %v1633_v44  ;;  %v1634_v48 = vadd.f32 %v1632_v45, %v1624_v35  ;;  %v2920_v45 = vld [vmem:[%s4363_s2 + $0x31] ss:$0 sm:$0xff] }
 0xa8f   :  { %3445 = vtanh.f32 %v1635_v46  ;;  %v1636_v51 = vmul.f32 0.7978846, %v1634_v48 }
 0xa91   :  { %3447 = vtanh.f32 %v1636_v51 }
 0xa99   :  { %v3446_v52 = vpop.eup %3445 }
 0xa9a   :  { %v1639_v53 = vadd.f32 1.0, %v3446_v52 }
 0xa9b   :  { %v3448_v55 = vpop.eup %3447 }
 0xa9c   :  { %v1641_v56 = vmul.f32 0.5, %v1639_v53  ;;  %v1640_v57 = vadd.f32 1.0, %v3448_v55 }
 0xa9e   :  { %v1642_v59 = vmul.f32 0.5, %v1640_v57  ;;  %v1643_v60 = vmul.f32 %v1641_v56, %v1621_v20 }
 0xaa0   :  { %v1644_v61 = vmul.f32 %v1642_v59, %v1624_v35 }
 0xaa2   :  { %v1645_v62 = vpack.c.bf16 %v1644_v61, %v1643_v60 }
 0xaa4   :  { %3187 = vmatmul.mubr.msk.bf16.vlgmr.msra.gmra.mrb[24].mxu0 %vm1682_vm12, %v1645_v62 }
 0xaa5   :  { %3206 = vmatprep.mubr.msk.bf16.mxu0 %vm3500_vm10, %v3499_v49 }
 0xb77   :  { %v1720_v1 = vpop.f32.mrb[24].mxu0 }
 0xb78   :  { %v1721_v3 = vadd.f32 %v2908_v63, %v1720_v1  ;;  %v3188_v28 = vpop.f32.mrb[25].mxu0 }
 0xb79   :  { %v1723_v0 = vpop.f32.mrb[26].mxu0 }
 0xb7a   :  { %v1724_v4 = vadd.f32 %v2908_v63, %v1723_v0  ;;  %v3189_v5 = vpop.f32.mrb[27].mxu0  ;;  %v1727_v12 = vadd.f32 %v1721_v3, %v1560_v21 }
 0xb7c   :  { %v1729_v7 = vsel %vm776_vm9, %v1727_v12, 0.0  ;;  %v1728_v9 = vadd.f32 %v1724_v4, %v1561_v18  ;;  %v3393_v18 = vld [vmem:[%s4364_s3 + $0x10] sm:$0xff]  }
 0xb7d   :  { %1730 = vadd.xlane.f32.xlu0 %v1729_v7  ;;  %3191 = vmatpush3.bf16.msra.mxu1 %v3393_v18 }
 0xb7e   :  { %v1732_v34 = vsel %vm776_vm9, %v1728_v9, 0.0  ;;  %3192 = vmatprep.subr.bf16.mxu1 %v3499_v49 }
 0xb81   :  { %1733 = vadd.xlane.f32.xlu0 %v1732_v34  ;;  %3193 = vmatpush3.bf16.msra.mxu1 %v3394_v23 }
 0xb82   :  { %3198 = vmatprep.subr.bf16.mxu1 %v3499_v49 }
 0xc0a   :  { %v1731_v38 = vpop.xlane.xlu0 %1730 }
 0xc0b   :  { %v1735_v8 = vmul.f32 0.03125, %v1731_v38 }
 0xc0d   :  { %v1737_v10 = vsub.f32 %v1727_v12, %v1735_v8 }
 0xc0e   :  { %v1734_v11 = vpop.xlane.xlu0 %1733 }
 0xc0f   :  { %v1736_v14 = vmul.f32 0.03125, %v1734_v11  ;;  %v1739_v15 = vmul.f32 %v1737_v10, %v1737_v10 }
 0xc11   :  { %v1738_v16 = vsub.f32 %v1728_v9, %v1736_v14  ;;  %v1741_v17 = vsel %vm776_vm9, %v1739_v15, 0.0 }
 0xc12   :  { %1742 = vadd.xlane.f32.xlu1 %v1741_v17 }
 0xc13   :  { %v1740_v19 = vmul.f32 %v1738_v16, %v1738_v16 }
 0xc15   :  { %v1744_v21 = vsel %vm776_vm9, %v1740_v19, 0.0 }
 0xc16   :  { %1745 = vadd.xlane.f32.xlu0 %v1744_v21 }
 0xc9f   :  { %v1743_v13 = vpop.xlane.xlu1 %1742 }
 0xca0   :  { %v1747_v24 = vmul.f32 0.03125, %v1743_v13 }
 0xca2   :  { %v1749_v25 = vadd.f32 1e-12, %v1747_v24 }
 0xca3   :  { %v1746_v26 = vpop.xlane.xlu0 %1745 }
 0xca4   :  { %3449 = vrsqrt.f32 %v1749_v25  ;;  %v1748_v22 = vmul.f32 0.03125, %v1746_v26 }
 0xca6   :  { %v1750_v27 = vadd.f32 1e-12, %v1748_v22 }
 0xca8   :  { %3451 = vrsqrt.f32 %v1750_v27 }
 0xcae   :  { %v3450_v20 = vpop.eup %3449 }
 0xcaf   :  { %v1753_v29 = vmul.f32 %v3450_v20, %v1737_v10 }
 0xcb1   :  { %v1759_v35 = vmul.f32 %v2914_v32, %v1753_v29 }
 0xcb2   :  { %v3452_v33 = vpop.eup %3451 }
 0xcb3   :  { %v1754_v37 = vmul.f32 %v3452_v33, %v1738_v16  ;;  %v4119_v41 = vadd.f32 %v2915_v39, %v1759_v35 }
 0xcb5   :  { %v1760_v36 = vmul.f32 %v2914_v32, %v1754_v37 }
 0xcb7   :  { %v4121_v43 = vadd.f32 %v2915_v39, %v1760_v36 }
 0xcb9   :  { %v1775_v44 = vpack.c.bf16 %v4121_v43, %v4119_v41 }
 0xcbb   :  { %3195 = vmatmul.mubr.msk.bf16.vlgmr.msra.gmra.mrb[24].mxu1 %vm776_vm9, %v1775_v44 }
 0xcbc   :  { %3200 = vmatprep.mubr.msk.bf16.mxu1 %vm3500_vm10, %v3499_v49 }
 0xd8e   :  { %v1834_v46 = vpop.f32.mrb[24].mxu1 }
 0xd8f   :  { %v1835_v48 = vadd.f32 %v2920_v45, %v1834_v46  ;;  %v3196_v51 = vpop.f32.mrb[25].mxu1 }
 0xd90   :  { %v1837_v52 = vpop.f32.mrb[26].mxu1 }
 0xd91   :  { %v1838_v53 = vadd.f32 %v2920_v45, %v1837_v52  ;;  %v3197_v55 = vpop.f32.mrb[27].mxu1  ;;  %v1925_v56 = vmul.f32 %v1835_v48, %v3867_v31  ;;  %v1842_v57 = vmul.f32 %v1835_v48, %v3865_v30  ;;  %v2101_v59 = vmul.f32 %v1835_v48, %v3876_v40 }
 0xd92   :  { %v2231_v60 = vmul.f32 %v1835_v48, %v3892_v50  ;;  %v4136_v61 = vmul.f32 %v1835_v48, %v3953_v54  ;;  %v4139_v62 = vmul.f32 %v1835_v48, %v3992_v42  ;;  %v4142_v63 = vmul.f32 %v1835_v48, %v4000_v47 }
 0xd93   :  { %v1926_v1 = vmul.f32 %v1838_v53, %v3867_v31  ;;  %v1843_v3 = vmul.f32 %v1838_v53, %v3865_v30  ;;  %v2102_v28 = vmul.f32 %v1838_v53, %v3876_v40  ;;  %v2232_v0 = vmul.f32 %v1838_v53, %v3892_v50 }
 0xd94   :  { %v1841_v4 = vpack.c.bf16 %v1838_v53, %v1835_v48  ;;  %v4149_v5 = vmul.f32 %v1838_v53, %v3953_v54  ;;  %v4152_v12 = vmul.f32 %v1838_v53, %v3992_v42  ;;  %v4155_v7 = vmul.f32 %v1838_v53, %v4000_v47 }
 0xd95   :  { %v1927_v9 = vpack.c.bf16 %v1926_v1, %v1925_v56  ;;  %v1844_v34 = vpack.c.bf16 %v1843_v3, %v1842_v57  ;;  %v2103_v38 = vpack.c.bf16 %v2102_v28, %v2101_v59  ;;  %v2233_v31 = vpack.c.bf16 %v2232_v0, %v2231_v60 }
 0xd96   :  { %v1930_v30 = vpack.c.bf16 %v4149_v5, %v4136_v61  ;;  %v1847_v40 = vpack.c.bf16 %v4152_v12, %v4139_v62  ;;  %v2106_v50 = vpack.c.bf16 %v4155_v7, %v4142_v63  ;;  %v4166_v54 = vmul.f32 %v1835_v48, %v4012_v58  ;;  %v3395_v62 = vld [vmem:[%s4365_s4 + $0x10] sm:$0xff]  }
 0xd97   :  { %1932 = vrot.lane.b32.xlu1 %v1927_v9, %s3502_s26  ;;  %1849 = vrot.lane.b32.xlu0 %v1844_v34, %s3502_s26  ;;  %v4169_v42 = vmul.f32 %v1838_v53, %v4012_v58 }
 0xd99   :  { %v2236_v47 = vpack.c.bf16 %v4169_v42, %v4166_v54 }
 0xd9b   :  { %2108 = vrot.lane.b32.xlu1 %v2103_v38, %s3502_s26 }
 0xd9f   :  { %2238 = vrot.lane.b32.xlu1 %v2233_v31, %s3502_s26 }
 0xe09   :  { %v1933_v8 = vpop.permute.xlu1 %1932  ;;  %v1850_v10 = vpop.permute.xlu0 %1849 }
 0xe0a   :  { %v1935_v11 = vsel %vm776_vm9, %v1933_v8, 0  ;;  %v1855_v14 = vsel %vm776_vm9, %v1850_v10, 0 }
 0xe0b   :  { %3199 = vmatpush3.bf16.xpose.msra.mxu1 %v1855_v14  ;;  %3205 = vmatpush3.bf16.xpose.msra.mxu0 %v1935_v11 }
 0xe0c   :  { %3222 = vmatprep.subr.bf16.mxu0 %v3499_v49  ;;  %3210 = vmatprep.subr.bf16.mxu1 %v3499_v49 }
 0xe0d   :  { %v2109_v58 = vpop.permute.xlu1 %2108 }
 0xe0e   :  { %v2111_v15 = vsel %vm776_vm9, %v2109_v58, 0 }
 0xe11   :  { %v2239_v16 = vpop.permute.xlu1 %2238 }
 0xe12   :  { %3201 = vmatmul.mubr.msk.bf16.vlgmr.msra.gmra.mrb[28].mxu1 %vm776_vm9, %v1841_v4  ;;  %3207 = vmatmul.mubr.msk.bf16.vlgmr.msra.gmra.mrb[28].mxu0 %vm776_vm9, %v1841_v4  ;;  %v2241_v17 = vsel %vm776_vm9, %v2239_v16, 0 }
 0xe13   :  { %3223 = vmatpush3.bf16.xpose.msra.mxu0 %v2111_v15  ;;  %3224 = vmatprep.mubr.msk.bf16.mxu0 %vm3500_vm10, %v3499_v49 }
 0xe14   :  { %3234 = vmatprep.subr.bf16.mxu0 %v3499_v49  ;;  %3212 = vmatprep.mubr.msk.bf16.mxu1 %vm3500_vm10, %v3499_v49 }
 0xe1a   :  { %3225 = vmatmul.mubr.msk.bf16.vlgmr.msra.gmra.mrb[32].mxu0 %vm776_vm9, %v1841_v4 }
 0xe1b   :  { %3235 = vmatpush3.bf16.xpose.msra.mxu0 %v2241_v17  ;;  %3236 = vmatprep.mubr.msk.bf16.mxu0 %vm3500_vm10, %v3499_v49 }
 0xe1c   :  { %3246 = vmatprep.subr.bf16.mxu0 %v3499_v49 }
 0xe22   :  { %3237 = vmatmul.mubr.msk.bf16.vlgmr.msra.gmra.mrb[36].mxu0 %vm776_vm9, %v1841_v4 }
 0xe23   :  { %3250 = vmatprep.mubr.msk.bf16.mxu0 %vm3500_vm10, %v3499_v49  ;;  %3247 = vmatpush3.bf16.msra.mxu0 %v3395_v62 }
 0xe24   :  { %3248 = vmatprep.subr.bf16.mxu0 %v3499_v49 }
 0xee5   :  { %v1891_v19 = vpop.f32.mrb[28].mxu1  ;;  %v1971_v21 = vpop.f32.mrb[28].mxu0 }
 0xee6   :  { %v1898_v18 = vmul.f32 0.35355338, %v1891_v19  ;;  %v1978_v23 = vmul.f32 0.35355338, %v1971_v21  ;;  %v3202_v13 = vpop.f32.mrb[29].mxu1  ;;  %v3208_v24 = vpop.f32.mrb[29].mxu0 }
 0xee7   :  { %v1894_v25 = vpop.f32.mrb[30].mxu1  ;;  %v1974_v26 = vpop.f32.mrb[30].mxu0 }
 0xee8   :  { %v1979_v22 = vmul.f32 0.35355338, %v1974_v26  ;;  %v3203_v27 = vpop.f32.mrb[31].mxu1  ;;  %v3209_v20 = vpop.f32.mrb[31].mxu0  ;;  %v1980_v29 = vadd.f32 %v1978_v23, %v3926_v2  ;;  %v1899_v32 = vmul.f32 0.35355338, %v1894_v25  ;;  %v4199_v37 = vadd.f32 %v1898_v18, %v3926_v2 }
 0xeea   :  { %v1982_v33 = vsel %vm964_vm11, %v1980_v29, -inf  ;;  %v1981_v35 = vadd.f32 %v1979_v22, %v3931_v6  ;;  %v1902_v46 = vsel %vm964_vm11, %v4199_v37, -inf  ;;  %v1901_v48 = vadd.f32 %v1899_v32, %v3931_v6 }
 0xeeb   :  { %1983 = vmax.xlane.f32.xlu0 %v1982_v33 }
 0xeec   :  { %v1985_v39 = vsel %vm964_vm11, %v1981_v35, -inf  ;;  %v1905_v56 = vsel %vm964_vm11, %v1901_v48, -inf }
 0xeed   :  { %1986 = vmax.xlane.f32.xlu1 %v1985_v39  ;;  %v2147_v36 = vpop.f32.mrb[32].mxu0 }
 0xeee   :  { %v2154_v44 = vmul.f32 0.35355338, %v2147_v36  ;;  %v3226_v45 = vpop.f32.mrb[33].mxu0 }
 0xeef   :  { %1903 = vmax.xlane.f32.xlu0 %v1902_v46  ;;  %v2150_v51 = vpop.f32.mrb[34].mxu0 }
 0xef0   :  { %v2155_v52 = vmul.f32 0.35355338, %v2150_v51  ;;  %v3227_v53 = vpop.f32.mrb[35].mxu0  ;;  %v4206_v55 = vadd.f32 %v2154_v44, %v3926_v2 }
 0xef2   :  { %v2158_v57 = vsel %vm964_vm11, %v4206_v55, -inf  ;;  %v2157_v59 = vadd.f32 %v2155_v52, %v3931_v6 }
 0xef3   :  { %1906 = vmax.xlane.f32.xlu0 %v1905_v56  ;;  %2159 = vmax.xlane.f32.xlu1 %v2158_v57 }
 0xef4   :  { %v2161_v28 = vsel %vm964_vm11, %v2157_v59, -inf }
 0xef5   :  { %v2277_v60 = vpop.f32.mrb[36].mxu0 }
 0xef6   :  { %v2284_v1 = vmul.f32 0.35355338, %v2277_v60  ;;  %v3238_v3 = vpop.f32.mrb[37].mxu0 }
 0xef7   :  { %2162 = vmax.xlane.f32.xlu0 %v2161_v28  ;;  %v2280_v0 = vpop.f32.mrb[38].mxu0 }
 0xef8   :  { %v2285_v4 = vmul.f32 0.35355338, %v2280_v0  ;;  %v3239_v9 = vpop.f32.mrb[39].mxu0  ;;  %v2286_v34 = vadd.f32 %v2284_v1, %v3926_v2 }
 0xefa   :  { %v2288_v38 = vsel %vm964_vm11, %v2286_v34, -inf  ;;  %v2287_v31 = vadd.f32 %v2285_v4, %v3931_v6 }
 0xefb   :  { %2289 = vmax.xlane.f32.xlu1 %v2288_v38 }
 0xefc   :  { %v2291_v8 = vsel %vm964_vm11, %v2287_v31, -inf }
 0xefd   :  { %2292 = vmax.xlane.f32.xlu0 %v2291_v8 }
 0xf78   :  { %v1984_v10 = vpop.xlane.xlu0 %1983 }
 0xf79   :  { %v1988_v11 = vsub.f32 %v1980_v29, %v1984_v10 }
 0xf7a   :  { %v1987_v14 = vpop.xlane.xlu1 %1986 }
 0xf7b   :  { %v1990_v58 = vmul.f32 1.442695, %v1988_v11  ;;  %v1989_v15 = vsub.f32 %v1981_v35, %v1987_v14 }
 0xf7c   :  { %v1904_v16 = vpop.xlane.xlu0 %1903 }
 0xf7d   :  { %3453 = vpow2.f32 %v1990_v58  ;;  %v1992_v17 = vmul.f32 1.442695, %v1989_v15  ;;  %v1908_v53 = vsub.f32 %v4199_v37, %v1904_v16 }
 0xf7f   :  { %3455 = vpow2.f32 %v1992_v17  ;;  %v1910_v56 = vmul.f32 1.442695, %v1908_v53 }
 0xf80   :  { %v1907_v19 = vpop.xlane.xlu0 %1906  ;;  %v2160_v18 = vpop.xlane.xlu1 %2159 }
 0xf81   :  { %v1909_v21 = vsub.f32 %v1901_v48, %v1907_v19  ;;  %v2164_v57 = vsub.f32 %v4206_v55, %v2160_v18 }
 0xf83   :  { %v1912_v2 = vmul.f32 1.442695, %v1909_v21 }
 0xf84   :  { %v2163_v23 = vpop.xlane.xlu0 %2162 }
 0xf85   :  { %3457 = vpow2.f32 %v1912_v2  ;;  %v2165_v6 = vsub.f32 %v2157_v59, %v2163_v23  ;;  %v2166_v59 = vmul.f32 1.442695, %v2164_v57 }
 0xf87   :  { %v3454_v13 = vpop.eup %3453  ;;  %v2168_v24 = vmul.f32 1.442695, %v2165_v6  ;;  %v3396_v6 = vld [vmem:[%s4365_s4 + $0x18] sm:$0xff]  }
 0xf88   :  { %v2290_v25 = vpop.xlane.xlu1 %2289  ;;  %v1994_v26 = vsel %vm964_vm11, %v3454_v13, 0.0  ;;  %3249 = vmatpush3.bf16.msra.mxu0 %v3396_v6 }
 0xf89   :  { %v3456_v22 = vpop.eup %3455  ;;  %3459 = vpow2.f32 %v2168_v24  ;;  %v2294_v27 = vsub.f32 %v2286_v34, %v2290_v25  ;;  %1995 = vadd.xlane.f32.xlu1 %v1994_v26  ;;  %3254 = vmatprep.subr.bf16.mxu0 %v3499_v49 }
 0xf8a   :  { %v2293_v20 = vpop.xlane.xlu0 %2292  ;;  %v1997_v29 = vsel %vm964_vm11, %v3456_v22, 0.0 }
 0xf8b   :  { %v2296_v32 = vmul.f32 1.442695, %v2294_v27  ;;  %v2295_v33 = vsub.f32 %v2287_v31, %v2293_v20  ;;  %1998 = vadd.xlane.f32.xlu0 %v1997_v29  ;;  %v2936_v27 = vld [vmem:[%s4363_s2 + $0x32] ss:$0 sm:$0xff] }
 0xf8d   :  { %3461 = vpow2.f32 %v2296_v32  ;;  %v2298_v35 = vmul.f32 1.442695, %v2295_v33 }
 0xf8f   :  { %v3458_v39 = vpop.eup %3457  ;;  %3463 = vpow2.f32 %v2298_v35 }
 0xf90   :  { %v1917_v36 = vsel %vm964_vm11, %v3458_v39, 0.0  ;;  %3465 = vpow2.f32 %v1910_v56 }
 0xf91   :  { %1918 = vadd.xlane.f32.xlu0 %v1917_v36  ;;  %3467 = vpow2.f32 %v2166_v59 }
 0xf93   :  { %v4220_v44 = vpop.eup %3459 }
 0xf94   :  { %v2173_v45 = vsel %vm964_vm11, %v4220_v44, 0.0 }
 0xf95   :  { %2174 = vadd.xlane.f32.xlu0 %v2173_v45 }
 0xf97   :  { %v4224_v46 = vpop.eup %3461 }
 0xf98   :  { %v2300_v48 = vsel %vm964_vm11, %v4224_v46, 0.0 }
 0xf99   :  { %v4228_v51 = vpop.eup %3463  ;;  %2301 = vadd.xlane.f32.xlu0 %v2300_v48 }
 0xf9a   :  { %2006 = vrot.lane.b32.xlu1 %v1930_v30, %s3503_s27  ;;  %v2303_v52 = vsel %vm964_vm11, %v4228_v51, 0.0  ;;  %v3466_v60 = vpop.eup %3465 }
 0xf9b   :  { %v1914_v61 = vsel %vm964_vm11, %v3466_v60, 0.0  ;;  %v3468_v5 = vpop.eup %3467 }
 0xf9c   :  { %v2170_v30 = vsel %vm964_vm11, %v3468_v5, 0.0 }
 0xf9d   :  { %2304 = vadd.xlane.f32.xlu0 %v2303_v52 }
 0xfb3   :  { %2054 = vrot.lane.b32.xlu0 %v1847_v40, %s3503_s27 }
 0xfbe   :  { %1915 = vadd.xlane.f32.xlu1 %v1914_v61 }
 0xfc2   :  { %2171 = vadd.xlane.f32.xlu1 %v2170_v30 }
 0xfd3   :  { %2182 = vrot.lane.b32.xlu1 %v2106_v50, %s3503_s27 }
 0xfd7   :  { %2312 = vrot.lane.b32.xlu1 %v2236_v47, %s3503_s27 }
0x1016   :  { %v1996_v12 = vpop.xlane.xlu1 %1995 }
0x1017   :  { %3469 = vrcp.f32 %v1996_v12 }
0x1018   :  { %v1999_v40 = vpop.xlane.xlu0 %1998 }
0x1019   :  { %3471 = vrcp.f32 %v1999_v40 }
0x101a   :  { %v2007_v37 = vpop.permute.xlu1 %2006 }
0x101b   :  { %3211 = vmatpush3.bf16.msra.mxu1 %v2007_v37 }
0x101c   :  { %3216 = vmatprep.subr.bf16.mxu1 %v3499_v49 }
0x101e   :  { %v1919_v63 = vpop.xlane.xlu0 %1918 }
0x101f   :  { %3473 = vrcp.f32 %v1919_v63 }
0x1021   :  { %v3470_v7 = vpop.eup %3469 }
0x1022   :  { %v2175_v50 = vpop.xlane.xlu0 %2174  ;;  %v2001_v42 = vmul.f32 %v3470_v7, %v3454_v13 }
0x1023   :  { %v3472_v54 = vpop.eup %3471 }
0x1024   :  { %v2003_v47 = vmul.f32 %v3472_v54, %v3456_v22 }
0x1026   :  { %v2302_v55 = vpop.xlane.xlu0 %2301  ;;  %v2004_v1 = vpack.c.bf16 %v2003_v47, %v2001_v42 }
0x1028   :  { %3213 = vmatmul.mubr.msk.bf16.vlgmr.msra.gmra.mrb[32].mxu1 %vm964_vm11, %v2004_v1  ;;  %v2941_v1 = vld [vmem:[%s4363_s2 + $0x34] ss:$0 sm:$0xff] }
0x1029   :  { %3218 = vmatprep.mubr.msk.bf16.mxu1 %vm3500_vm10, %v3499_v49  ;;  %v3474_v9 = vpop.eup %3473 }
0x102a   :  { %v2305_v3 = vpop.xlane.xlu0 %2304  ;;  %v1923_v38 = vmul.f32 %v3474_v9, %v3458_v39  ;;  %v3399_v9 = vld [vmem:[%s4367_s6 + $0x20] sm:$0xff]  }
0x102e   :  { %v2055_v28 = vpop.permute.xlu0 %2054 }
0x102f   :  { %3217 = vmatpush3.bf16.msra.mxu1 %v2055_v28 }
0x1030   :  { %3228 = vmatprep.subr.bf16.mxu1 %v3499_v49 }
0x104b   :  { %v1916_v0 = vpop.xlane.xlu1 %1915 }
0x104c   :  { %3475 = vrcp.f32 %v1916_v0 }
0x104f   :  { %v2172_v4 = vpop.xlane.xlu1 %2171 }
0x1050   :  { %3477 = vrcp.f32 %v2172_v4 }
0x1051   :  { %3479 = vrcp.f32 %v2175_v50  ;;  %v2940_v50 = vld [vmem:[%s4363_s2 + $0x33] ss:$0 sm:$0xff] }
0x1052   :  { %3481 = vrcp.f32 %v2305_v3 }
0x1053   :  { %v2183_v10 = vpop.permute.xlu1 %2182  ;;  %3483 = vrcp.f32 %v2302_v55 }
0x1056   :  { %v3476_v34 = vpop.eup %3475 }
0x1057   :  { %v1921_v31 = vmul.f32 %v3476_v34, %v3466_v60  ;;  %v2313_v17 = vpop.permute.xlu1 %2312  ;;  %v3400_v34 = vld [vmem:[%s4367_s6 + $0x28] sm:$0xff]  }
0x1059   :  { %v1924_v8 = vpack.c.bf16 %v1923_v38, %v1921_v31  ;;  %v3401_v38 = vld [vmem:[%s4367_s6 + $0x30] sm:$0xff]   ;;  %v3402_v31 = vld [vmem:[%s4367_s6 + $0x38] sm:$0xff]  }
0x105a   :  { %v3478_v11 = vpop.eup %3477 }
0x105b   :  { %3219 = vmatmul.mubr.msk.bf16.vlgmr.msra.gmra.mrb[32].mxu1 %vm964_vm11, %v1924_v8  ;;  %v3480_v14 = vpop.eup %3479  ;;  %v2177_v58 = vmul.f32 %v3478_v11, %v3468_v5  ;;  %v3398_v5 = vld [vmem:[%s4366_s5 + $0x18] sm:$0xff]   ;;  %v2946_v8 = vld [vmem:[%s4363_s2 + $0x35] ss:$0 sm:$0xff] }
0x105c   :  { %3229 = vmatpush3.bf16.msra.mxu1 %v2183_v10  ;;  %3230 = vmatprep.mubr.msk.bf16.mxu1 %vm3500_vm10, %v3499_v49  ;;  %v2179_v15 = vmul.f32 %v3480_v14, %v4220_v44  ;;  %v3482_v19 = vpop.eup %3481 }
0x105d   :  { %3240 = vmatprep.subr.bf16.mxu1 %v3499_v49  ;;  %v3484_v21 = vpop.eup %3483  ;;  %v2309_v2 = vmul.f32 %v3482_v19, %v4228_v51 }
0x105e   :  { %v2180_v16 = vpack.c.bf16 %v2179_v15, %v2177_v58  ;;  %v2307_v18 = vmul.f32 %v3484_v21, %v4224_v46 }
0x1060   :  { %v2310_v23 = vpack.c.bf16 %v2309_v2, %v2307_v18 }
0x1067   :  { %3231 = vmatmul.mubr.msk.bf16.vlgmr.msra.gmra.mrb[32].mxu1 %vm964_vm11, %v2180_v16 }
0x1068   :  { %3241 = vmatpush3.bf16.msra.mxu1 %v2313_v17  ;;  %3242 = vmatprep.mubr.msk.bf16.mxu1 %vm3500_vm10, %v3499_v49 }
0x1069   :  { %3262 = vmatprep.subr.bf16.mxu1 %v3499_v49 }
0x1073   :  { %3243 = vmatmul.mubr.msk.bf16.vlgmr.msra.gmra.mrb[32].mxu1 %vm964_vm11, %v2310_v23 }
0x1074   :  { %3270 = vmatprep.mubr.msk.bf16.mxu1 %vm3500_vm10, %v3499_v49  ;;  %3263 = vmatpush3.bf16.msra.mxu1 %v3399_v9  ;;  %v2965_v9 = vld [vmem:[%s4363_s2 + $0x38] ss:$0 sm:$0xff] }
0x1075   :  { %3264 = vmatprep.subr.bf16.mxu1 %v3499_v49 }
0x1078   :  { %3265 = vmatpush3.bf16.msra.mxu1 %v3400_v34 }
0x1079   :  { %3266 = vmatprep.subr.bf16.mxu1 %v3499_v49 }
0x107c   :  { %3267 = vmatpush3.bf16.msra.mxu1 %v3401_v38 }
0x107d   :  { %3268 = vmatprep.subr.bf16.mxu1 %v3499_v49 }
0x1080   :  { %3269 = vmatpush3.bf16.msra.mxu1 %v3402_v31 }
0x1146   :  { %v2352_v13 = vpop.f32.mrb[32].mxu1 }
0x1147   :  { %v3244_v24 = vpop.f32.mrb[33].mxu1 }
0x1148   :  { %v2355_v25 = vpop.f32.mrb[34].mxu1 }
0x1149   :  { %v2361_v26 = vpack.c.bf16 %v2355_v25, %v2352_v13  ;;  %v3245_v22 = vpop.f32.mrb[35].mxu1 }
0x114b   :  { %3251 = vmatmul.mubr.msk.bf16.vlgmr.msra.gmra.mrb[40].mxu0 %vm776_vm9, %v2361_v26 }
0x114c   :  { %3258 = vmatprep.mubr.msk.bf16.mxu0 %vm3500_vm10, %v3499_v49 }
0x121e   :  { %v2420_v20 = vpop.f32.mrb[40].mxu0 }
0x121f   :  { %v2421_v29 = vadd.f32 %v2936_v27, %v2420_v20  ;;  %v3252_v32 = vpop.f32.mrb[41].mxu0 }
0x1220   :  { %v2423_v33 = vpop.f32.mrb[42].mxu0 }
0x1221   :  { %v2424_v35 = vadd.f32 %v2936_v27, %v2423_v33  ;;  %v3253_v39 = vpop.f32.mrb[43].mxu0  ;;  %v2427_v36 = vadd.f32 %v2421_v29, %v4119_v41 }
0x1223   :  { %v2429_v44 = vsel %vm776_vm9, %v2427_v36, 0.0  ;;  %v2428_v45 = vadd.f32 %v2424_v35, %v4121_v43  ;;  %v3397_v43 = vld [vmem:[%s4366_s5 + $0x10] sm:$0xff]  }
0x1224   :  { %2430 = vadd.xlane.f32.xlu1 %v2429_v44  ;;  %3255 = vmatpush3.bf16.msra.mxu0 %v3397_v43 }
0x1225   :  { %v2432_v46 = vsel %vm776_vm9, %v2428_v45, 0.0  ;;  %3256 = vmatprep.subr.bf16.mxu0 %v3499_v49 }
0x1226   :  { %2433 = vadd.xlane.f32.xlu0 %v2432_v46 }
0x1228   :  { %3257 = vmatpush3.bf16.msra.mxu0 %v3398_v5 }
0x1229   :  { %3274 = vmatprep.subr.bf16.mxu0 %v3499_v49 }
0x12b1   :  { %v2431_v48 = vpop.xlane.xlu1 %2430 }
0x12b2   :  { %v2435_v51 = vmul.f32 0.03125, %v2431_v48 }
0x12b3   :  { %v2434_v52 = vpop.xlane.xlu0 %2433 }
0x12b4   :  { %v2437_v53 = vsub.f32 %v2427_v36, %v2435_v51  ;;  %v2436_v56 = vmul.f32 0.03125, %v2434_v52  ;;  %v2958_v36 = vld [vmem:[%s4363_s2 + $0x36] ss:$0 sm:$0xff] }
0x12b6   :  { %v2438_v57 = vsub.f32 %v2428_v45, %v2436_v56  ;;  %v2439_v59 = vmul.f32 %v2437_v53, %v2437_v53 }
0x12b8   :  { %v2441_v60 = vsel %vm776_vm9, %v2439_v59, 0.0  ;;  %v2440_v61 = vmul.f32 %v2438_v57, %v2438_v57 }
0x12b9   :  { %2442 = vadd.xlane.f32.xlu1 %v2441_v60 }
0x12ba   :  { %v2444_v41 = vsel %vm776_vm9, %v2440_v61, 0.0 }
0x12bb   :  { %2445 = vadd.xlane.f32.xlu0 %v2444_v41 }
0x1346   :  { %v2443_v30 = vpop.xlane.xlu1 %2442 }
0x1347   :  { %v2447_v62 = vmul.f32 0.03125, %v2443_v30 }
0x1348   :  { %v2446_v12 = vpop.xlane.xlu0 %2445 }
0x1349   :  { %v2449_v40 = vadd.f32 1e-12, %v2447_v62  ;;  %v2448_v37 = vmul.f32 0.03125, %v2446_v12 }
0x134b   :  { %3485 = vrsqrt.f32 %v2449_v40  ;;  %v2450_v63 = vadd.f32 1e-12, %v2448_v37 }
0x134d   :  { %3487 = vrsqrt.f32 %v2450_v63 }
0x1355   :  { %v3486_v7 = vpop.eup %3485 }
0x1356   :  { %v2453_v54 = vmul.f32 %v3486_v7, %v2437_v53 }
0x1357   :  { %v3488_v42 = vpop.eup %3487 }
0x1358   :  { %v2459_v47 = vmul.f32 %v2940_v50, %v2453_v54  ;;  %v2454_v55 = vmul.f32 %v3488_v42, %v2438_v57 }
0x135a   :  { %v2460_v3 = vmul.f32 %v2940_v50, %v2454_v55  ;;  %v2465_v28 = vadd.f32 %v2941_v1, %v2459_v47 }
0x135c   :  { %v2466_v0 = vadd.f32 %v2941_v1, %v2460_v3  ;;  %v2964_v1 = vld [vmem:[%s4363_s2 + $0x37] ss:$0 sm:$0xff] }
0x135e   :  { %v2467_v4 = vpack.c.bf16 %v2466_v0, %v2465_v28 }
0x1360   :  { %3259 = vmatmul.mubr.msk.bf16.vlgmr.msra.gmra.mrb[44].mxu0 %vm776_vm9, %v2467_v4 }
0x1361   :  { %3276 = vmatprep.mubr.msk.bf16.mxu0 %vm3500_vm10, %v3499_v49 }
0x1433   :  { %v2526_v10 = vpop.f32.mrb[44].mxu0 }
0x1434   :  { %v2527_v11 = vadd.f32 %v2946_v8, %v2526_v10  ;;  %v3260_v14 = vpop.f32.mrb[45].mxu0 }
0x1435   :  { %v2529_v58 = vpop.f32.mrb[46].mxu0  ;;  %v3403_v14 = vld [vmem:[%s4364_s3 + $0x20] sm:$0xff]  }
0x1436   :  { %v2533_v15 = vmul.f32 %v2527_v11, %v2527_v11  ;;  %v2530_v16 = vadd.f32 %v2946_v8, %v2529_v58  ;;  %v3261_v17 = vpop.f32.mrb[47].mxu0  ;;  %v2673_v8 = vld [vmem:[%s4363_s2 + $0x3] sm:$0x3]  ;;  %v3404_v58 = vld [vmem:[%s4364_s3 + $0x28] sm:$0xff]  }
0x1438   :  { %v2535_v19 = vmul.f32 %v2533_v15, %v2527_v11  ;;  %v2534_v21 = vmul.f32 %v2530_v16, %v2530_v16 }
0x143a   :  { %v2537_v2 = vmul.f32 0.044715, %v2535_v19  ;;  %v2536_v18 = vmul.f32 %v2534_v21, %v2530_v16 }
0x143c   :  { %v2539_v23 = vadd.f32 %v2537_v2, %v2527_v11  ;;  %v2538_v6 = vmul.f32 0.044715, %v2536_v18  ;;  %v2971_v2 = vld [vmem:[%s4363_s2 + $0x2] ss:$0 sm:$0xff] }
0x143e   :  { %v2541_v13 = vmul.f32 0.7978846, %v2539_v23  ;;  %v2540_v24 = vadd.f32 %v2538_v6, %v2530_v16 }
0x1440   :  { %3489 = vtanh.f32 %v2541_v13  ;;  %v2542_v25 = vmul.f32 0.7978846, %v2540_v24 }
0x1442   :  { %3491 = vtanh.f32 %v2542_v25 }
0x144a   :  { %v3490_v26 = vpop.eup %3489 }
0x144b   :  { %v2545_v22 = vadd.f32 1.0, %v3490_v26 }
0x144c   :  { %v3492_v27 = vpop.eup %3491 }
0x144d   :  { %v2547_v20 = vmul.f32 0.5, %v2545_v22  ;;  %v2546_v29 = vadd.f32 1.0, %v3492_v27 }
0x144f   :  { %v2548_v32 = vmul.f32 0.5, %v2546_v29  ;;  %v2549_v33 = vmul.f32 %v2547_v20, %v2527_v11  ;;  %v2674_v11 = vpack.c.bf16 %v2673_v8, %v2673_v8 }
0x1451   :  { %v2550_v35 = vmul.f32 %v2548_v32, %v2530_v16 }
0x1453   :  { %v2551_v39 = vpack.c.bf16 %v2550_v35, %v2549_v33 }
0x1455   :  { %3271 = vmatmul.mubr.msk.bf16.vlgmr.msra.gmra.mrb[36].mxu1 %vm1682_vm12, %v2551_v39 }
0x1528   :  { %v2626_v44 = vpop.f32.mrb[36].mxu1 }
0x1529   :  { %v2627_v45 = vadd.f32 %v2958_v36, %v2626_v44  ;;  %v3272_v46 = vpop.f32.mrb[37].mxu1 }
0x152a   :  { %v2629_v48 = vpop.f32.mrb[38].mxu1 }
0x152b   :  { %v2630_v51 = vadd.f32 %v2958_v36, %v2629_v48  ;;  %v3273_v52 = vpop.f32.mrb[39].mxu1  ;;  %v2633_v53 = vadd.f32 %v2627_v45, %v2465_v28 }
0x152d   :  { %v2635_v56 = vsel %vm776_vm9, %v2633_v53, 0.0  ;;  %v2634_v57 = vadd.f32 %v2630_v51, %v2466_v0 }
0x152e   :  { %2636 = vadd.xlane.f32.xlu1 %v2635_v56 }
0x152f   :  { %v2638_v59 = vsel %vm776_vm9, %v2634_v57, 0.0 }
0x1530   :  { %2639 = vadd.xlane.f32.xlu0 %v2638_v59 }
0x15bb   :  { %v2637_v60 = vpop.xlane.xlu1 %2636 }
0x15bc   :  { %v2641_v61 = vmul.f32 0.03125, %v2637_v60 }
0x15bd   :  { %v2640_v41 = vpop.xlane.xlu0 %2639 }
0x15be   :  { %v2643_v43 = vsub.f32 %v2633_v53, %v2641_v61  ;;  %v2642_v5 = vmul.f32 0.03125, %v2640_v41 }
0x15c0   :  { %v2644_v30 = vsub.f32 %v2634_v57, %v2642_v5  ;;  %v2645_v62 = vmul.f32 %v2643_v43, %v2643_v43 }
0x15c2   :  { %v2647_v12 = vsel %vm776_vm9, %v2645_v62, 0.0  ;;  %v2646_v40 = vmul.f32 %v2644_v30, %v2644_v30 }
0x15c3   :  { %2648 = vadd.xlane.f32.xlu1 %v2647_v12 }
0x15c4   :  { %v2650_v37 = vsel %vm776_vm9, %v2646_v40, 0.0 }
0x15c5   :  { %2651 = vadd.xlane.f32.xlu0 %v2650_v37 }
0x1650   :  { %v2649_v63 = vpop.xlane.xlu1 %2648 }
0x1651   :  { %v2653_v7 = vmul.f32 0.03125, %v2649_v63 }
0x1652   :  { %v2652_v50 = vpop.xlane.xlu0 %2651 }
0x1653   :  { %v2655_v54 = vadd.f32 1e-12, %v2653_v7  ;;  %v2654_v42 = vmul.f32 0.03125, %v2652_v50 }
0x1655   :  { %3493 = vrsqrt.f32 %v2655_v54  ;;  %v2656_v47 = vadd.f32 1e-12, %v2654_v42 }
0x1657   :  { %3495 = vrsqrt.f32 %v2656_v47 }
0x165f   :  { %v3494_v55 = vpop.eup %3493 }
0x1660   :  { %v2659_v3 = vmul.f32 %v3494_v55, %v2643_v43 }
0x1661   :  { %v3496_v28 = vpop.eup %3495 }
0x1662   :  { %v2660_v0 = vmul.f32 %v3496_v28, %v2644_v30  ;;  %v2665_v4 = vmul.f32 %v2964_v1, %v2659_v3 }
0x1664   :  { %v2666_v34 = vmul.f32 %v2964_v1, %v2660_v0  ;;  %v2671_v38 = vadd.f32 %v2965_v9, %v2665_v4 }
0x1666   :  { %v2672_v31 = vadd.f32 %v2965_v9, %v2666_v34 }
0x1668   :  { %v2675_v10 = vpack.c.bf16 %v2672_v31, %v2671_v38 }
0x166a   :  { %3275 = vmatpush3.bf16.msra.mxu0 %v2675_v10 }
0x166b   :  { %3280 = vmatprep.subr.bf16.mxu0 %v3499_v49 }
0x166d   :  { %3277 = vmatmul.mubr.msk.bf16.vlgmr.msra.gmra.mrb[48].mxu0 %vm964_vm11, %v2674_v11 }
0x166e   :  { %3281 = vmatpush3.bf16.msra.mxu0 %v3403_v14  ;;  %3284 = vmatprep.mubr.msk.bf16.mxu0 %vm3500_vm10, %v3499_v49 }
0x166f   :  { %3282 = vmatprep.subr.bf16.mxu0 %v3499_v49 }
0x1672   :  { %3283 = vmatpush3.bf16.msra.mxu0 %v3404_v58 }
0x1740   :  { %v2713_v15 = vpop.f32.mrb[48].mxu0 }
0x1741   :  { %v2719_v16 = vpack.c.bf16 %v2713_v15, %v2713_v15  ;;  %v3278_v17 = vpop.f32.mrb[49].mxu0 }
0x1742   :  { %v2716_v19 = vpop.f32.mrb[50].mxu0 }
0x1743   :  { %v3279_v21 = vpop.f32.mrb[51].mxu0  ;;  %3285 = vmatmul.mubr.msk.bf16.vlgmr.msra.gmra.mrb[52].mxu0 %vm776_vm9, %v2719_v16 }
0x1816   :  { %v2779_v18 = vpop.f32.mrb[52].mxu0 }
0x1817   :  { %v2780_v23 = vadd.f32 %v2971_v2, %v2779_v18  ;;  %v3286_v6 = vpop.f32.mrb[53].mxu0 }
0x1818   :  { %v2782_v49 = vpop.f32.mrb[54].mxu0 }
0x1819   :  { %2785 = vst [vmem:[%s4368_s7] sm:$0x3] %v2780_v23  ;;  %v3287_v13 = vpop.f32.mrb[55].mxu0 }

</bundles_post_ra>
